<compile_context>
chip_gen: v7x
topology: tpu7x:2x2x1
jax: 0.10.0
libtpu: 0.0.40
codegen_flags: <defaults>
</compile_context>

<pallas_src>
import math
import functools

import jax
import jax.numpy as jnp
from jax import lax
from jax.experimental import pallas as pl
from jax.experimental.pallas import tpu as pltpu


def _round_up(x, m):
    return ((x + m - 1) // m) * m


# --------------------------------------------------------------------------
# Pass 1: pointwise softmax statistics (entropy + argmax), tiled over H and W.
# --------------------------------------------------------------------------
def _pointwise_kernel(logit_ref, ent_ref, pred_ref):
    l = logit_ref[...].astype(jnp.float32)            # (C, th, tw)
    C = l.shape[0]

    m = jnp.max(l, axis=0, keepdims=True)             # (1, th, tw)
    x = l - m
    e = jnp.exp(x)
    s = jnp.sum(e, axis=0)                            # (th, tw)

    # H(p) = log(s) - sum(e * (l - m)) / s   (logsumexp form of
    # sum(-p*log(p+1e-6)); differs by O(C*1e-6) absolute, well inside tol).
    ent_ref[...] = jnp.log(s) - jnp.sum(e * x, axis=0) / s

    # argmax over channels, first-max tie-break (matches torch.argmax(p)).
    cls = lax.broadcasted_iota(jnp.int32, l.shape, 0)
    pred_ref[...] = jnp.min(jnp.where(l == m, cls, C), axis=0).astype(jnp.int8)


# --------------------------------------------------------------------------
# Pass 2: banded box sums with halo DMA, analytic count, fused purity, score.
# --------------------------------------------------------------------------
def _region_kernel(ent_hbm, pred_hbm, bh_ref, bw_ref,
                   score_ref, pur_ref, unc_ref,
                   ent_buf, pred_buf, sem,
                   *, H, W, C, r, tile_h, tile_w, hs, ws):
    i = pl.program_id(0)
    j = pl.program_id(1)
    h0 = pl.multiple_of(i * tile_h, 8)                # start row in padded map
    w0 = pl.multiple_of(j * tile_w, 128)              # start col in padded map

    # ---- halo-window DMA: HBM -> VMEM scratch (only tile+halo is resident) ---
    # TODO(synk): double-buffer the halo windows across grid steps to overlap
    #             the DMA with the previous tile's matmuls.
    cp_e = pltpu.make_async_copy(
        ent_hbm.at[pl.ds(h0, hs), pl.ds(w0, ws)], ent_buf, sem.at[0])
    cp_p = pltpu.make_async_copy(
        pred_hbm.at[pl.ds(h0, hs), pl.ds(w0, ws)], pred_buf, sem.at[1])
    cp_e.start()
    cp_p.start()
    cp_e.wait()
    cp_p.wait()

    e_win = ent_buf[...]                              # (hs, ws) f32
    p_win = pred_buf[...].astype(jnp.int32)           # (hs, ws), -1 = padding

    bh = bh_ref[...]                                  # (tile_h, hs)  bf16/f32
    bw = bw_ref[...]                                  # (ws, tile_w)  bf16/f32
    bh_f = bh.astype(jnp.float32)                     # small; f32 only for entropy path
    bw_f = bw.astype(jnp.float32)

    # ---- analytic count: clamped window extents (box conv of all-ones) -----
    gi = h0 + lax.broadcasted_iota(jnp.int32, (tile_h, tile_w), 0)  # global row
    gj = w0 + lax.broadcasted_iota(jnp.int32, (tile_h, tile_w), 1)  # global col
    cH = jnp.minimum(gi, r) + jnp.minimum(H - 1 - gi, r) + 1
    cW = jnp.minimum(gj, r) + jnp.minimum(W - 1 - gj, r) + 1
    # clamp guards rows/cols >= H/W in a partial last tile (sliced off later)
    count = jnp.maximum(cH, 1) * jnp.maximum(cW, 1)
    inv_count = 1.0 / count.astype(jnp.float32)       # (tile_h, tile_w)

    # ---- entropy box-sum (f32 matmuls; entropy values are not 0/1) ---------
    region_sum_entropy = jnp.dot(
        jnp.dot(bh_f, e_win, preferred_element_type=jnp.float32),
        bw_f, preferred_element_type=jnp.float32)     # (tile_h, tile_w)

    # ---- purity ------------------------------------------------------------
    # one-hot over channels, (C, hs, ws); 0/1 exact in bf16.
    cls = lax.broadcasted_iota(jnp.int32, (C, hs, ws), 0)
    oh = (p_win[None, :, :] == cls).astype(bh.dtype)

    # Fused W-band matmul over all channels: (C*hs, ws) @ (ws, tile_w).
    # Output counts <= 2r+1 <= 256 -> exact in bf16 (guarded in the wrapper).
    u = jnp.dot(oh.reshape(C * hs, ws), bw, preferred_element_type=bh.dtype)
    u = u.reshape(C, hs, tile_w)

    # Per-channel H-band matmul interleaved with the EUP log/accumulate, so
    # the transcendental work hides under the MXU drain.  The second matmul
    # must accumulate in f32 since counts can exceed 256 ((2r+1)^2).
    impur = jnp.zeros((tile_h, tile_w), jnp.float32)
    for ch in range(C):
        summary_c = jnp.dot(bh, u[ch], preferred_element_type=jnp.float32)
        dist = summary_c * inv_count
        impur = impur + (-dist) * jnp.log(dist + 1e-6)

    # NOTE: the PyTorch module hard-codes math.log(19) regardless of C.
    region_impurity = impur * (1.0 / math.log(19.0))
    prediction_uncertainty = region_sum_entropy * inv_count

    score_ref[...] = region_impurity * prediction_uncertainty
    pur_ref[...] = region_impurity
    unc_ref[...] = prediction_uncertainty


# --------------------------------------------------------------------------
# Wrapper
# --------------------------------------------------------------------------
def floating_region_score(logit_nchw, size=33, tile_h=None, tile_w=None,
                          tile_h1=None, tile_w1=None):
    """Returns (score, region_impurity, prediction_uncertainty), each (H, W)."""
    assert size % 2 == 1, 'error size'
    n, c, h, w = logit_nchw.shape
    assert n == 1
    r = size // 2
    logit = logit_nchw[0]                              # (C, H, W), bf16 or f32

    # -------- pass 1: pointwise maps (halo-free (H, W) tiling) --------------
    if tile_h1 is None:
        tile_h1 = min(128, _round_up(h, 32))
    if tile_w1 is None:
        tile_w1 = min(512, _round_up(w, 128))
    assert tile_h1 % 32 == 0 and tile_w1 % 128 == 0
    H1 = _round_up(h, tile_h1)
    W1 = _round_up(w, tile_w1)
    if (H1, W1) != (h, w):
        # TODO(synk): mask the last tile in-kernel instead of padding the full
        #             (C, H, W) tensor (extra HBM read+write when H1/W1 > H/W).
        logit = jnp.pad(logit, ((0, 0), (0, H1 - h), (0, W1 - w)))

    ent_full, pred_full = pl.pallas_call(
        _pointwise_kernel,
        out_shape=(jax.ShapeDtypeStruct((H1, W1), jnp.float32),
                   jax.ShapeDtypeStruct((H1, W1), jnp.int8)),
        grid=(H1 // tile_h1, W1 // tile_w1),
        in_specs=[pl.BlockSpec((c, tile_h1, tile_w1), lambda i, j: (0, i, j))],
        out_specs=(pl.BlockSpec((tile_h1, tile_w1), lambda i, j: (i, j)),
                   pl.BlockSpec((tile_h1, tile_w1), lambda i, j: (i, j))),
        compiler_params=pltpu.CompilerParams(
            dimension_semantics=("parallel", "parallel")),
    )(logit)

    ent = ent_full[:h, :w]
    pred = pred_full[:h, :w]

    # -------- pass 2: box sums + score (halo via manual DMA windows) --------
    if tile_h is None:
        tile_h = min(128, _round_up(h, 32))
    if tile_w is None:
        tile_w = min(512, _round_up(w, 128))
    assert tile_h % 32 == 0 and tile_w % 128 == 0

    halo_h = _round_up(2 * r, 8)                       # sublane-aligned halo
    halo_w = _round_up(2 * r, 128)                     # lane-aligned halo
    hs = tile_h + halo_h
    ws = tile_w + halo_w
    H2 = _round_up(h, tile_h)
    W2 = _round_up(w, tile_w)
    n_h, n_w = H2 // tile_h, W2 // tile_w
    Hp = H2 + halo_h
    Wp = W2 + halo_w

    # TODO(synk): fuse pass 1 and pass 2 (or have pass 1 write directly into
    #             the r-padded layout) to skip this HBM round trip.
    ent_pad = jnp.pad(ent, ((r, Hp - h - r), (r, Wp - w - r)))
    pred_pad = jnp.pad(pred, ((r, Hp - h - r), (r, Wp - w - r)),
                       constant_values=-1)             # -1 never matches a class

    # Single (bf16) copy of each band, built once on the host.  bf16 is exact
    # for 0/1 band entries and for partial counts <= size <= 256.
    mm_dtype = jnp.bfloat16 if size <= 256 else jnp.float32
    a_i = jnp.arange(tile_h)[:, None]
    h_i = jnp.arange(hs)[None, :]
    bh = ((h_i >= a_i) & (h_i <= a_i + 2 * r)).astype(mm_dtype)   # (tile_h, hs)
    w_i = jnp.arange(ws)[:, None]
    b_i = jnp.arange(tile_w)[None, :]
    bw = ((w_i >= b_i) & (w_i <= b_i + 2 * r)).astype(mm_dtype)   # (ws, tile_w)

    kern = functools.partial(_region_kernel, H=h, W=w, C=c, r=r,
                             tile_h=tile_h, tile_w=tile_w, hs=hs, ws=ws)

    score, purity, uncert = pl.pallas_call(
        kern,
        out_shape=tuple(jax.ShapeDtypeStruct((H2, W2), jnp.float32)
                        for _ in range(3)),
        grid=(n_h, n_w),
        in_specs=[pl.BlockSpec(memory_space=pl.ANY),            # ent_pad (HBM)
                  pl.BlockSpec(memory_space=pl.ANY),            # pred_pad (HBM)
                  pl.BlockSpec((tile_h, hs), lambda i, j: (0, 0)),   # B_H
                  pl.BlockSpec((ws, tile_w), lambda i, j: (0, 0))],  # B_W
        out_specs=tuple(pl.BlockSpec((tile_h, tile_w), lambda i, j: (i, j))
                        for _ in range(3)),
        scratch_shapes=[pltpu.VMEM((hs, ws), jnp.float32),      # entropy halo
                        pltpu.VMEM((hs, ws), jnp.int8),         # predict halo
                        pltpu.SemaphoreType.DMA((2,))],
        compiler_params=pltpu.CompilerParams(
            dimension_semantics=("parallel", "parallel")),
    )(ent_pad, pred_pad, bh, bw)

    return score[:h, :w], purity[:h, :w], uncert[:h, :w]


# --------------------------------------------------------------------------
# Pure-JAX reference mirroring the PyTorch module (NCHW convs).
# --------------------------------------------------------------------------
def _reference(logit_nchw, size):
    logit = logit_nchw[0].astype(jnp.float32)
    c, h, w = logit.shape
    pad = size // 2
    p = jax.nn.softmax(logit, axis=0)
    pixel_entropy = jnp.sum(-p * jnp.log(p + 1e-6), axis=0)[None, None]
    ones_k = jnp.ones((1, 1, size, size), jnp.float32)
    region_sum_entropy = lax.conv_general_dilated(
        pixel_entropy, ones_k, (1, 1), [(pad, pad), (pad, pad)],
        dimension_numbers=('NCHW', 'OIHW', 'NCHW'))
    predict = jnp.argmax(p, axis=0)
    one_hot = jnp.transpose(jax.nn.one_hot(predict, c, dtype=jnp.float32),
                            (2, 0, 1))[None]
    ones_dw = jnp.ones((c, 1, size, size), jnp.float32)
    summary = lax.conv_general_dilated(
        one_hot, ones_dw, (1, 1), [(pad, pad), (pad, pad)],
        dimension_numbers=('NCHW', 'OIHW', 'NCHW'), feature_group_count=c)
    count = jnp.sum(summary, axis=1, keepdims=True)
    dist = summary / count
    region_impurity = jnp.sum(-dist * jnp.log(dist + 1e-6), axis=1,
                              keepdims=True) / math.log(19)
    prediction_uncertainty = region_sum_entropy / count
    score = region_impurity * prediction_uncertainty
    return score[0, 0], region_impurity[0, 0], prediction_uncertainty[0, 0]


if __name__ == "__main__":
    key = jax.random.PRNGKey(0)
    in_channels, H, W = 19, 64, 256
    size = 9            # odd, as the module requires (default 33; small test)

    logit = jax.random.normal(key, (1, in_channels, H, W), dtype=jnp.float32)

    # Small tiles so both passes run 2x2 grids (exercises halos & boundaries).
    score, purity, uncert = floating_region_score(
        logit, size=size, tile_h=32, tile_w=128, tile_h1=32, tile_w1=128)
    jax.block_until_ready((score, purity, uncert))

    score_r, purity_r, uncert_r = _reference(logit, size)
    assert jnp.allclose(score, score_r, rtol=1e-3, atol=1e-3), "score mismatch"
    assert jnp.allclose(purity, purity_r, rtol=1e-3, atol=1e-3), "purity mismatch"
    assert jnp.allclose(uncert, uncert_r, rtol=1e-3, atol=1e-3), "uncertainty mismatch"

    print("KERNEL_OK")
</pallas_src>

<mosaic_0001>
module attributes {stable_mosaic.version = 11 : i64} {
  func.func @_pointwise_kernel(%arg0: i32, %arg1: i32, %arg2: memref<19x32x128xf32, #tpu.memory_space<vmem>>, %arg3: memref<32x128xf32, #tpu.memory_space<vmem>>, %arg4: memref<32x128xi8, #tpu.memory_space<vmem>>) attributes {dimension_semantics = [#tpu.dimension_semantics<parallel>, #tpu.dimension_semantics<parallel>], iteration_bounds = array<i64: 2, 2>, scalar_prefetch = 0 : i64, scratch_operands = 0 : i64, tpu.core_type = #tpu.core_type<tc>, window_params = [{transform_indices = @transform_0, window_bounds = array<i64: 19, 32, 128>}, {transform_indices = @transform_1, window_bounds = array<i64: 32, 128>}, {transform_indices = @transform_2, window_bounds = array<i64: 32, 128>}]} {
    %c0 = arith.constant 0 : index
    %c0_0 = arith.constant 0 : index
    %c0_1 = arith.constant 0 : index
    %0 = vector.load %arg2[%c0, %c0_0, %c0_1] : memref<19x32x128xf32, #tpu.memory_space<vmem>>, vector<19x32x128xf32>
    %cst = arith.constant dense<0xFF800000> : vector<32x128xf32>
    %1 = vector.multi_reduction <maximumf>, %0, %cst [0] : vector<19x32x128xf32> to vector<32x128xf32>
    %2 = vector.shape_cast %1 : vector<32x128xf32> to vector<1x32x128xf32>
    %3 = vector.broadcast %2 : vector<1x32x128xf32> to vector<19x32x128xf32>
    %4 = arith.subf %0, %3 : vector<19x32x128xf32>
    %5 = math.exp %4 : vector<19x32x128xf32>
    %cst_2 = arith.constant dense<0.000000e+00> : vector<32x128xf32>
    %6 = vector.multi_reduction <add>, %5, %cst_2 [0] : vector<19x32x128xf32> to vector<32x128xf32>
    %7 = math.log %6 : vector<32x128xf32>
    %8 = arith.mulf %5, %4 : vector<19x32x128xf32>
    %cst_3 = arith.constant dense<0.000000e+00> : vector<32x128xf32>
    %9 = vector.multi_reduction <add>, %8, %cst_3 [0] : vector<19x32x128xf32> to vector<32x128xf32>
    %10 = arith.divf %9, %6 : vector<32x128xf32>
    %11 = arith.subf %7, %10 : vector<32x128xf32>
    %c0_4 = arith.constant 0 : index
    %c0_5 = arith.constant 0 : index
    %12 = vector.load %arg3[%c0_4, %c0_5] : memref<32x128xf32, #tpu.memory_space<vmem>>, vector<32x128xf32>
    tpu.vector_store %arg3[%c0_4, %c0_5], %11 {strides = array<i32>} : memref<32x128xf32, #tpu.memory_space<vmem>>, vector<32x128xf32>,
    %13 = tpu.iota {dimensions = array<i32: 0>} : vector<19x32x128xi32>
    %14 = vector.broadcast %2 : vector<1x32x128xf32> to vector<19x32x128xf32>
    %15 = arith.cmpf oeq, %0, %14 : vector<19x32x128xf32>
    %c19_i32 = arith.constant 19 : i32
    %16 = vector.broadcast %c19_i32 : i32 to vector<19x32x128xi32>
    %17 = arith.select %15, %13, %16 : vector<19x32x128xi1>, vector<19x32x128xi32>
    %cst_6 = arith.constant dense<2147483647> : vector<32x128xi32>
    %18 = vector.multi_reduction <minsi>, %17, %cst_6 [0] : vector<19x32x128xi32> to vector<32x128xi32>
    %19 = arith.trunci %18 : vector<32x128xi32> to vector<32x128xi8>
    %c0_7 = arith.constant 0 : index
    %c0_8 = arith.constant 0 : index
    %20 = vector.load %arg4[%c0_7, %c0_8] : memref<32x128xi8, #tpu.memory_space<vmem>>, vector<32x128xi8>
    tpu.vector_store %arg4[%c0_7, %c0_8], %19 {strides = array<i32>} : memref<32x128xi8, #tpu.memory_space<vmem>>, vector<32x128xi8>,
    return
  }
  func.func @transform_0(%arg0: i32, %arg1: i32) -> (i32, i32, i32) {
    %c0_i32 = arith.constant 0 : i32
    %c0_i32_0 = arith.constant 0 : i32
    return %c0_i32, %arg0, %arg1 : i32, i32, i32
  }
  func.func @transform_1(%arg0: i32, %arg1: i32) -> (i32, i32) {
    %c0_i32 = arith.constant 0 : i32
    return %arg0, %arg1 : i32, i32
  }
  func.func @transform_2(%arg0: i32, %arg1: i32) -> (i32, i32) {
    %c0_i32 = arith.constant 0 : i32
    return %arg0, %arg1 : i32, i32
  }
}

</mosaic_0001>

<bundles_post_ra>
// kernel: tpu_custom_call.1
= control target key start
LH: loop header
LB: loop body
LE: loop exit
PB: predicated region body
PF: predicated region fallthrough
CT: control target
= control target key end

     0   :  { %8 = vsyncpa [#allocation3], 0  ;;  %s4111_s0 = inlined_call_operand.hbm [shape: f32[19,64,256], index: 0, kind: input, shape index: {}]   ;;  %s4112_s1 = inlined_call_operand.hbm [shape: f32[64,256], index: 1, kind: output, shape index: {0}]   ;;  %s4113_s2 = inlined_call_operand.hbm [shape: s8[64,256], index: 2, kind: output, shape index: {1}]  }
   0x1   :  { %10 = vsyncpa [#allocation3 + $0x1], 0 }
   0x2   :  { %11 = vsyncpa [#allocation4], 0 }
   0x3   :  { %13 = vsyncpa [#allocation4 + $0x1], 0 }
   0x4   :  { %14 = vsyncpa [#allocation7], 0 }
   0x5   :  { %16 = vsyncpa [#allocation7 + $0x1], 0  ;;  %s1823_s9 = smov 0   ;;  %s1825_s10 = smov 0  }
   0x6   :  { %s1827_s11 = smov 0   ;;  %s1829_s12 = smov 0  }
   0x7   :  { %s1831_s13 = smov 0   ;;  %s1833_s14 = smov 0  }
   0x8   :  { %s1835_s15 = smov 0   ;;  %s1837_s16 = smov 0  }
   0x9 LB: > { %s1298_s17 = sadd.s32 4294967295, %s1793_s16   ;;  %s1299_s18 = sadd.s32 4294967294, %s1793_s16   ;;  %s1793_s16 = sphi %s1837_s16, %s22_s16   ;;  %s1789_s15 = sphi %s1835_s15, %s4622_s15   ;;  %s1785_s14 = sphi %s1833_s14, %s4621_s14   ;;  %s1781_s13 = sphi %s1831_s13, %s4620_s13   ;;  %s1777_s12 = sphi %s1829_s12, %s4619_s12   ;;  %s1773_s11 = sphi %s1827_s11, %s4618_s11   ;;  %s1769_s10 = sphi %s1825_s10, %s4617_s10   ;;  %s1765_s9 = sphi %s1823_s9, %s4616_s9  }
   0xa   : > { %s31_s19 = sadd.s32 1, %s1785_s14  ;;  %s34_s20 = sadd.s32 1, %s1789_s15 }
   0xb   : > { %p32_p0 = scmp.ge.s32.totalorder %s31_s19, 2  ;;  %p50_p1 = scmp.ne.s32.totalorder %s1773_s11, %s1769_s10 }
   0xc   : > { %p51_p2 = scmp.eq.s32.totalorder %s1793_s16, 0  ;;  %p56_p5 = scmp.ne.s32.totalorder %s1769_s10, %s1765_s9 }
   0xd   : > { %s4624_s19 = smov (%p32_p0, %s31_s19), 0  ;;  %s4626_s20 = smov (!%p32_p0, %s34_s20), %s1789_s15 }
   0xe   : > { %s39_s21 = ssub.s32 %s1785_s14, %s4624_s19  ;;  %p1875_p3 = por %p51_p2, %p50_p1 }
   0xf   : > { %p36_p4 = scmp.ge.s32.totalorder %s4626_s20, 2  ;;  %p57_p6 = scmp.eq.s32.totalorder %s1298_s17, 0 }
  0x10   : > { %p82_p7 = scmp.eq.s32.totalorder %s1298_s17, 3  ;;  %p88_p10 = scmp.eq.s32.totalorder %s1299_s18, 3 }
  0x11   : > { %s4628_s20 = smov (%p36_p4, %s4626_s20), 0  ;;  %p1883_p8 = por %p57_p6, %p56_p5 }
  0x12   : > { %4257 = sst [smem:[#allocation14_spill]] %s4628_s20  ;;  %p1887_p9 = por %p82_p7, %p50_p1 }
  0x13   : > { %s38_s25 = ssub.s32 %s1789_s15, %s4628_s20  ;;  %s43_s27 = sadd.s32 1, %s1773_s11 }
  0x14   : > { %s40_s26 = sor.u32 %s39_s21, %s38_s25  ;;  %p1894_p12 = por %p88_p10, %p56_p5 }
  0x15   : > { %p41_p11 = scmp.eq.s32.totalorder %s40_s26, 0  ;;  %p1301_p13 = scmp.ge.s32.totalorder %s1793_s16, 4 }
  0x17   : > { %s1899_s29 = scalar_select %p41_p11, %s1773_s11, %s43_s27  }
  0x18   : > { %132 = sbr.rel (%p1301_p13) target bundleno = 47 (0x2f), region = 16 }
  0x1f   : > { %s136_s30 = sand.u32 1, %s1773_s11   ;;  %s1319_s3 = sshll.u32 %s1789_s15, 3 }
  0x20   : > { %s1321_s4 = smul.u32 608, %s136_s30  ;;  %s146_s5 = sadd.s32 %s1785_s14, %s1319_s3 }
  0x21   : > { %s1304_s6 = sshll.u32 %s146_s5, 7  ;;  %s1795_s26 = smov 2048  }
  0x22   : > { %s148_s17 = scalar_lea.hbm %s4111_s0, %s1304_s6  ;;  %s140_s18 = scalar_lea.vmem [#allocation2], %s1321_s4 }
  0x23   : > { %s161_s21 = sshll.u32 %s140_s18, 4  ;;  %1324 = sst [smem:[#allocation9]] (%p1875_p3), %s1795_s26  ;;  %s162_s21 = int_to_ptr.vmem [resolvable:$true] %s161_s21 }
  0x24   : > { %s1323_s25 = scalar_select %p1875_p3, [#allocation0], [#allocation10] }
  0x25   : > { %s1796_s20 = smov 512   ;;  %s1797_s3 = smov 4  }
  0x26   : > { %s153_s27 = sld [smem:[%s1323_s25]]   ;;  %s1798_s5 = smov 256  }
  0x27   : > { %1325 = sst [smem:[#allocation9 + $0x1]] (%p1875_p3), %s1796_s20  ;;  %s1799_s4 = smov 128  }
  0x28   : > { %1326 = sst [smem:[#allocation9 + $0x2]] (%p1875_p3), %s1797_s3  ;;  %s1800_s6 = smov 8  }
  0x29   : > { %1327 = sst [smem:[#allocation9 + $0x3]] (%p1875_p3), %s1798_s5  ;;  %s137_s18 = scalar_lea.sflag [#allocation3], %s136_s30 }
  0x2a   : > { %1328 = sst [smem:[#allocation9 + $0x4]] (%p1875_p3), %s1799_s4  ;;  %s1801_s26 = smov [#allocation8]  }
  0x2b   : > { %1329 = sst [smem:[#allocation9 + $0x5]] (%p1875_p3), %s1800_s6 }
  0x2c   : > { %s1305_s7 = sshll.u32 %s153_s27, 26 }
  0x2d   : > { %s1306_s8 = sadd.s32 134217728, %s1305_s7 }
  0x2e   : > { %1330 = dma.general (%p1875_p3), %s148_s17, 9728, %s162_s21, %s137_s18, %s1801_s26, [#allocation9], %s1306_s8, 0  }
  0x2f PF: > { %p1307_p0 = scmp.ge.s32.totalorder %s1793_s16, 1  ;;  %p182_p1 = scmp.lt.s32.totalorder %s1793_s16, 5 }
  0x31   : > { %p183_p2 = pnand %p1307_p0, %p182_p1 }
  0x33   : > { %186 = sbr.rel (%p183_p2) target bundleno = 339 (0x153), region = 24 }
  0x3a   : > { %s1927_s20 = sand.u32 1, %s1769_s10  }
  0x3b   : > { %s1322_s25 = smul.u32 608, %s1927_s20  ;;  %s189_s27 = scalar_lea.sflag [#allocation3], %s1927_s20 }
  0x3d   : > { %s1931_s3 = scalar_lea.vmem [#allocation2], %s1322_s25 }
  0x3e   : > { %1752 = dma.done.wait (%p1883_p8), %s189_s27, 9728  }
  0x3f   : > { %1754 = vsyncadd (%p1883_p8), %s189_s27, 4294957568  ;;  %v1938_v0 = vld [vmem:[%s1931_s3] sm:$0xff]  ;;  %v1941_v1 = vld [vmem:[%s1931_s3 + $0x8] sm:$0xff]  ;;  %s1308_s22 = sshll.u32 %s1927_s20, 5  ;;  %s1320_s30 = sshll.u32 %s1781_s13, 3 }
  0x40   : > { %v1944_v2 = vld [vmem:[%s1931_s3 + $0x20] sm:$0xff]  ;;  %v1947_v3 = vld [vmem:[%s1931_s3 + $0x28] sm:$0xff]  ;;  %v1960_v8 = vld [vmem:[%s1931_s3 + $0x50] sm:$0xff]  ;;  %s3038_s23 = scalar_lea.vmem [#allocation5], %s1308_s22  ;;  %s3125_s17 = sadd.s32 %s1777_s12, %s1320_s30 }
  0x41   : > { %v1950_v4 = vld [vmem:[%s1931_s3 + $0x40] sm:$0xff]  ;;  %v296_v5 = vmax.f32 %v1938_v0, %v1944_v2  ;;  %v314_v6 = vmax.f32 %v1941_v1, %v1947_v3  ;;  %v1957_v7 = vld [vmem:[%s1931_s3 + $0x48] sm:$0xff]  ;;  %v1963_v9 = vld [vmem:[%s1931_s3 + $0x58] sm:$0xff]  ;;  %s1314_s21 = sshll.u32 %s3125_s17, 7  ;;  %s1161_s5 = sshll.u32 %s3038_s23, 4  ;;  %s3279_s5 = int_to_ptr.vmem [resolvable:$true] %s1161_s5 }
  0x42   : > { %v1966_v10 = vld [vmem:[%s1931_s3 + $0x60] sm:$0xff]  ;;  %v1969_v11 = vld [vmem:[%s1931_s3 + $0x68] sm:$0xff]  ;;  %v1972_v12 = vld [vmem:[%s1931_s3 + $0x70] sm:$0xff]  ;;  %s3257_s7 = scalar_lea.hbm %s4112_s1, %s1314_s21  ;;  %s1141_s8 = scalar_lea.sflag [#allocation4], %s1927_s20 }
  0x43   : > { %v297_v13 = vmax.f32 %v296_v5, %v1950_v4  ;;  %v315_v14 = vmax.f32 %v314_v6, %v1957_v7  ;;  %v333_v15 = vmax.f32 %v1972_v12, %v1960_v8  ;;  %v1979_v16 = vld [vmem:[%s1931_s3 + $0x78] sm:$0xff]  ;;  %v1982_v17 = vld [vmem:[%s1931_s3 + $0x80] sm:$0xff]  ;;  %v1985_v18 = vld [vmem:[%s1931_s3 + $0x88] sm:$0xff]  ;;  %s1663_s18 = scalar_lea.vmem %s3279_s5, 512  ;;  %s1803_s26 = smov [#allocation5]  }
  0x44   : > { %v351_v19 = vmax.f32 %v1979_v16, %v1963_v9  ;;  %v1990_v20 = vld [vmem:[%s1931_s3 + $0x90] sm:$0xff]  ;;  %v1993_v21 = vld [vmem:[%s1931_s3 + $0x98] sm:$0xff]  ;;  %v1996_v22 = vld [vmem:[%s1931_s3 + $0xa0] sm:$0xff]  ;;  %p1664_p3 = scmp.ne.s32.totalorder %s3279_s5, %s1663_s18  ;;  %s1667_s25 = sshll.u32 %s1803_s26, 4  ;;  %s1668_s25 = int_to_ptr.vmem [resolvable:$false] %s1667_s25 }
  0x45   : > { %v298_v23 = vmax.f32 %v297_v13, %v1966_v10  ;;  %v316_v24 = vmax.f32 %v315_v14, %v1969_v11  ;;  %v334_v25 = vmax.f32 %v333_v15, %v1990_v20  ;;  %v2002_v26 = vld [vmem:[%s1931_s3 + $0xa8] sm:$0xff]  ;;  %v2005_v27 = vld [vmem:[%s1931_s3 + $0xb0] sm:$0xff]  ;;  %v2008_v28 = vld [vmem:[%s1931_s3 + $0xb8] sm:$0xff]  ;;  %s1669_s27 = scalar_lea.vmem %s1668_s25, 1024  ;;  %p1670_p6 = scmp.lt.s32.totalorder %s3279_s5, %s1668_s25 }
  0x46   : > { %v352_v29 = vmax.f32 %v351_v19, %v1993_v21  ;;  %v2012_v30 = vld [vmem:[%s1931_s3 + $0xd0] sm:$0xff]  ;;  %v2018_v34 = vld [vmem:[%s1931_s3 + $0xc0] sm:$0xff]  ;;  %v2021_v35 = vld [vmem:[%s1931_s3 + $0xc8] sm:$0xff]  ;;  %p1665_p4 = pnand %p1664_p3, %p1887_p9  ;;  %p1671_p7 = scmp.lt.s32.totalorder %s1669_s27, %s1663_s18 }
  0x47   : > { %v299_v31 = vmax.f32 %v298_v23, %v1982_v17  ;;  %v317_v32 = vmax.f32 %v316_v24, %v1985_v18  ;;  %v335_v33 = vmax.f32 %v334_v25, %v2005_v27  ;;  %v2024_v36 = vld [vmem:[%s1931_s3 + $0xd8] sm:$0xff]  ;;  %v2028_v38 = vld [vmem:[%s1931_s3 + $0xf0] sm:$0xff]  ;;  %v2034_v42 = vld [vmem:[%s1931_s3 + $0xe0] sm:$0xff] }
  0x48   : > { %v353_v37 = vmax.f32 %v352_v29, %v2008_v28  ;;  %v2037_v43 = vld [vmem:[%s1931_s3 + $0xe8] sm:$0xff]  ;;  %v2040_v44 = vld [vmem:[%s1931_s3 + $0xf8] sm:$0xff]  ;;  %v2044_v46 = vld [vmem:[%s1931_s3 + $0x110] sm:$0xff]  ;;  %p1666_p5 = pneg %p1665_p4  ;;  %p1672_p8 = por %p1671_p7, %p1670_p6 }
  0x49   : > { %v300_v39 = vmax.f32 %v299_v31, %v1996_v22  ;;  %v318_v40 = vmax.f32 %v317_v32, %v2002_v26  ;;  %v336_v41 = vmax.f32 %v335_v33, %v2012_v30  ;;  %v2050_v50 = vld [vmem:[%s1931_s3 + $0x100] sm:$0xff]  ;;  %v2053_v51 = vld [vmem:[%s1931_s3 + $0x108] sm:$0xff]  ;;  %v2056_v52 = vld [vmem:[%s1931_s3 + $0x118] sm:$0xff] }
  0x4a   : > { %v354_v45 = vmax.f32 %v353_v37, %v2024_v36  ;;  %v2060_v54 = vld [vmem:[%s1931_s3 + $0x130] sm:$0xff]  ;;  %v2066_v58 = vld [vmem:[%s1931_s3 + $0x120] sm:$0xff]  ;;  %v2069_v59 = vld [vmem:[%s1931_s3 + $0x128] sm:$0xff]  ;;  %p1673_p10 = pnand %p1672_p8, %p1666_p5 }
  0x4b   : > { %v301_v47 = vmax.f32 %v300_v39, %v2018_v34  ;;  %v319_v48 = vmax.f32 %v318_v40, %v2021_v35  ;;  %v337_v49 = vmax.f32 %v336_v41, %v2028_v38  ;;  %v2072_v60 = vld [vmem:[%s1931_s3 + $0x138] sm:$0xff]  ;;  %v2076_v62 = vld [vmem:[%s1931_s3 + $0x150] sm:$0xff]  ;;  %v2082_v13 = vld [vmem:[%s1931_s3 + $0x140] sm:$0xff] }
  0x4c   : > { %v355_v53 = vmax.f32 %v354_v45, %v2040_v44  ;;  %v2085_v14 = vld [vmem:[%s1931_s3 + $0x148] sm:$0xff]  ;;  %v2088_v15 = vld [vmem:[%s1931_s3 + $0x158] sm:$0xff]  ;;  %v2092_v23 = vld [vmem:[%s1931_s3 + $0x170] sm:$0xff] }
  0x4d   : > { %v302_v55 = vmax.f32 %v301_v47, %v2034_v42  ;;  %v320_v56 = vmax.f32 %v319_v48, %v2037_v43  ;;  %v338_v57 = vmax.f32 %v337_v49, %v2044_v46  ;;  %4261 = vst [vmem:[#allocation15_spill] sm:$0xff] %v2092_v23  ;;  %v2098_v31 = vld [vmem:[%s1931_s3 + $0x160] sm:$0xff]  ;;  %v2101_v32 = vld [vmem:[%s1931_s3 + $0x168] sm:$0xff]  ;;  %v2104_v33 = vld [vmem:[%s1931_s3 + $0x178] sm:$0xff] }
  0x4e   : > { %v356_v61 = vmax.f32 %v355_v53, %v2056_v52  ;;  %4262 = vst [vmem:[#allocation16_spill] sm:$0xff] %v2101_v32  ;;  %4263 = vst [vmem:[#allocation17_spill] sm:$0xff] %v2104_v33  ;;  %v2108_v39 = vld [vmem:[%s1931_s3 + $0x190] sm:$0xff]  ;;  %v2114_v47 = vld [vmem:[%s1931_s3 + $0x180] sm:$0xff] }
  0x4f   : > { %v303_v63 = vmax.f32 %v302_v55, %v2050_v50  ;;  %v321_v5 = vmax.f32 %v320_v56, %v2053_v51  ;;  %v339_v6 = vmax.f32 %v338_v57, %v2060_v54  ;;  %4264 = vst [vmem:[#allocation18_spill] sm:$0xff] %v2108_v39  ;;  %4265 = vst [vmem:[#allocation19_spill] sm:$0xff] %v2114_v47  ;;  %v2117_v48 = vld [vmem:[%s1931_s3 + $0x188] sm:$0xff]  ;;  %v2120_v49 = vld [vmem:[%s1931_s3 + $0x198] sm:$0xff] }
  0x50   : > { %v357_v19 = vmax.f32 %v356_v61, %v2072_v60  ;;  %4266 = vst [vmem:[#allocation20_spill] sm:$0xff] %v2117_v48  ;;  %4267 = vst [vmem:[#allocation21_spill] sm:$0xff] %v2120_v49  ;;  %v2124_v55 = vld [vmem:[%s1931_s3 + $0x1b0] sm:$0xff] }
  0x51   : > { %v304_v24 = vmax.f32 %v303_v63, %v2066_v58  ;;  %v322_v25 = vmax.f32 %v321_v5, %v2069_v59  ;;  %v340_v29 = vmax.f32 %v339_v6, %v2076_v62  ;;  %4268 = vst [vmem:[#allocation22_spill] sm:$0xff] %v2124_v55  ;;  %v2130_v63 = vld [vmem:[%s1931_s3 + $0x1a0] sm:$0xff]  ;;  %v2133_v5 = vld [vmem:[%s1931_s3 + $0x1a8] sm:$0xff]  ;;  %v2136_v6 = vld [vmem:[%s1931_s3 + $0x1b8] sm:$0xff] }
  0x52   : > { %v358_v37 = vmax.f32 %v357_v19, %v2088_v15  ;;  %4269 = vst [vmem:[#allocation23_spill] sm:$0xff] %v2130_v63  ;;  %4270 = vst [vmem:[#allocation24_spill] sm:$0xff] %v2133_v5 }
  0x53   : > { %v305_v40 = vmax.f32 %v304_v24, %v2082_v13  ;;  %v323_v41 = vmax.f32 %v322_v25, %v2085_v14  ;;  %v341_v45 = vmax.f32 %v340_v29, %v2092_v23  ;;  %4271 = vst [vmem:[#allocation25_spill] sm:$0xff] %v2136_v6  ;;  %v2140_v24 = vld [vmem:[%s1931_s3 + $0x1d0] sm:$0xff] }
  0x54   : > { %v359_v53 = vmax.f32 %v358_v37, %v2104_v33  ;;  %4272 = vst [vmem:[#allocation26_spill] sm:$0xff] %v2140_v24 }
  0x55   : > { %v306_v56 = vmax.f32 %v305_v40, %v2098_v31  ;;  %v324_v57 = vmax.f32 %v323_v41, %v2101_v32  ;;  %v342_v61 = vmax.f32 %v341_v45, %v2108_v39  ;;  %v2146_v40 = vld [vmem:[%s1931_s3 + $0x1c0] sm:$0xff]  ;;  %v2149_v41 = vld [vmem:[%s1931_s3 + $0x1c8] sm:$0xff]  ;;  %v2152_v45 = vld [vmem:[%s1931_s3 + $0x1d8] sm:$0xff] }
  0x56   : > { %v360_v19 = vmax.f32 %v359_v53, %v2120_v49  ;;  %4273 = vst [vmem:[#allocation27_spill] sm:$0xff] %v2146_v40  ;;  %4274 = vst [vmem:[#allocation28_spill] sm:$0xff] %v2149_v41  ;;  %v2156_v53 = vld [vmem:[%s1931_s3 + $0x1f0] sm:$0xff] }
  0x57   : > { %v307_v25 = vmax.f32 %v306_v56, %v2114_v47  ;;  %v325_v29 = vmax.f32 %v324_v57, %v2117_v48  ;;  %v343_v37 = vmax.f32 %v342_v61, %v2124_v55  ;;  %4275 = vst [vmem:[#allocation29_spill] sm:$0xff] %v2152_v45  ;;  %4276 = vst [vmem:[#allocation30_spill] sm:$0xff] %v2156_v53  ;;  %v2162_v61 = vld [vmem:[%s1931_s3 + $0x1f8] sm:$0xff]  ;;  %v2166_v48 = vld [vmem:[%s1931_s3 + $0x1e0] sm:$0xff] }
  0x58   : > { %v361_v39 = vmax.f32 %v360_v19, %v2136_v6  ;;  %4277 = vst [vmem:[#allocation31_spill] sm:$0xff] %v2162_v61  ;;  %4278 = vst [vmem:[#allocation32_spill] sm:$0xff] %v2166_v48  ;;  %v2169_v47 = vld [vmem:[%s1931_s3 + $0x1e8] sm:$0xff]  ;;  %v2175_v6 = vld [vmem:[%s1931_s3 + $0x210] sm:$0xff] }
  0x59   : > { %v308_v49 = vmax.f32 %v307_v25, %v2130_v63  ;;  %v326_v56 = vmax.f32 %v325_v29, %v2133_v5  ;;  %v344_v57 = vmax.f32 %v343_v37, %v2140_v24  ;;  %4279 = vst [vmem:[#allocation33_spill] sm:$0xff] %v2169_v47  ;;  %4280 = vst [vmem:[#allocation34_spill] sm:$0xff] %v2175_v6  ;;  %v227_v5 = vld [vmem:[%s1931_s3 + $0x38] sm:$0xff] }
  0x5a   : > { %v362_v55 = vmax.f32 %v361_v39, %v2152_v45  ;;  %v2179_v39 = vld [vmem:[%s1931_s3 + $0x218] sm:$0xff] }
  0x5b   : > { %v309_v19 = vmax.f32 %v308_v49, %v2146_v40  ;;  %v327_v25 = vmax.f32 %v326_v56, %v2149_v41  ;;  %v345_v29 = vmax.f32 %v344_v57, %v2156_v53  ;;  %4281 = vst [vmem:[#allocation35_spill] sm:$0xff] %v2179_v39  ;;  %v2184_v49 = vld [vmem:[%s1931_s3 + $0x200] sm:$0xff]  ;;  %v2187_v56 = vld [vmem:[%s1931_s3 + $0x208] sm:$0xff]  ;;  %v222_v40 = vld [vmem:[%s1931_s3 + $0x10] sm:$0xff] }
  0x5c   : > { %v363_v37 = vmax.f32 %v362_v55, %v2162_v61  ;;  %4282 = vst [vmem:[#allocation36_spill] sm:$0xff] %v2184_v49  ;;  %4283 = vst [vmem:[#allocation37_spill] sm:$0xff] %v2187_v56  ;;  %v2192_v55 = vld [vmem:[%s1931_s3 + $0x230] sm:$0xff]  ;;  %v2195_v61 = vld [vmem:[%s1931_s3 + $0x238] sm:$0xff] }
  0x5d   : > { %v310_v45 = vmax.f32 %v309_v19, %v2166_v48  ;;  %v328_v24 = vmax.f32 %v327_v25, %v2169_v47  ;;  %v346_v57 = vmax.f32 %v345_v29, %v2175_v6  ;;  %4284 = vst [vmem:[#allocation38_spill] sm:$0xff] %v2192_v55  ;;  %4285 = vst [vmem:[#allocation39_spill] sm:$0xff] %v2195_v61  ;;  %v2200_v47 = vld [vmem:[%s1931_s3 + $0x220] sm:$0xff]  ;;  %v2203_v48 = vld [vmem:[%s1931_s3 + $0x228] sm:$0xff] }
  0x5e   : > { %v364_v53 = vmax.f32 %v363_v37, %v2179_v39  ;;  %v226_v29 = vld [vmem:[%s1931_s3 + $0x30] sm:$0xff]  ;;  %v223_v6 = vld [vmem:[%s1931_s3 + $0x18] sm:$0xff] }
  0x5f   : > { %v311_v19 = vmax.f32 %v310_v45, %v2184_v49  ;;  %v329_v25 = vmax.f32 %v328_v24, %v2187_v56  ;;  %v347_v41 = vmax.f32 %v346_v57, %v2192_v55  ;;  %v2210_v39 = vld [vmem:[%s1931_s3 + $0x250] sm:$0xff]  ;;  %v2215_v63 = vld [vmem:[%s1931_s3 + $0x258] sm:$0xff]  ;;  %v2220_v56 = vld [vmem:[%s1931_s3 + $0x240] sm:$0xff]  ;;  %v332_v55 = vmax.f32 %v222_v40, %v226_v29 }
  0x60   : > { %v365_v37 = vmax.f32 %v364_v53, %v2195_v61  ;;  %v2223_v49 = vld [vmem:[%s1931_s3 + $0x248] sm:$0xff]  ;;  %v350_v53 = vmax.f32 %v223_v6, %v227_v5 }
  0x61   : > { %v312_v45 = vmax.f32 %v311_v19, %v2200_v47  ;;  %v330_v24 = vmax.f32 %v329_v25, %v2203_v48  ;;  %v348_v57 = vmax.f32 %v347_v41, %v2210_v39 }
  0x62   : > { %v366_v33 = vmax.f32 %v365_v37, %v2215_v63 }
  0x63   : > { %v2228_v61 = vmax.f32 %v312_v45, %v2220_v56  ;;  %v2231_v23 = vmax.f32 %v330_v24, %v2223_v49  ;;  %v2233_v32 = vmax.f32 %v348_v57, %v332_v55  ;;  %v4333_v24 = vld [vmem:[#allocation16_spill] sm:$0xff]  ;;  %v4335_v57 = vld [vmem:[#allocation15_spill] sm:$0xff] }
  0x64   : > { %v2235_v19 = vmax.f32 %v366_v33, %v350_v53 }
  0x65   : > { %4286 = vst [vmem:[#allocation40_spill] sm:$0xff] %v2228_v61  ;;  %4287 = vst [vmem:[#allocation41_spill] sm:$0xff] %v2231_v23  ;;  %v2239_v25 = vsub.f32 %v1938_v0, %v2228_v61  ;;  %v2243_v41 = vsub.f32 %v1941_v1, %v2231_v23  ;;  %v2247_v37 = vsub.f32 %v1944_v2, %v2228_v61 }
  0x66   : > { %4288 = vst [vmem:[#allocation42_spill] sm:$0xff] %v2233_v32  ;;  %4289 = vst [vmem:[#allocation43_spill] sm:$0xff] %v2235_v19  ;;  %v2250_v45 = vsub.f32 %v222_v40, %v2233_v32  ;;  %v2254_v55 = vsub.f32 %v1947_v3, %v2231_v23  ;;  %v2257_v33 = vsub.f32 %v226_v29, %v2233_v32 }
  0x67   : > { %4290 = vst [vmem:[#allocation44_spill] sm:$0xff] %v2239_v25  ;;  %4291 = vst [vmem:[#allocation45_spill] sm:$0xff] %v2243_v41  ;;  %v2261_v0 = vsub.f32 %v1950_v4, %v2228_v61  ;;  %v2264_v1 = vsub.f32 %v223_v6, %v2235_v19  ;;  %v2267_v2 = vsub.f32 %v227_v5, %v2235_v19  ;;  %v444_v6 = vmul.f32 1.442695, %v2239_v25 }
  0x68   : > { %4292 = vst [vmem:[#allocation46_spill] sm:$0xff] %v2247_v37  ;;  %4293 = vst [vmem:[#allocation47_spill] sm:$0xff] %v2250_v45  ;;  %v2271_v40 = vsub.f32 %v1957_v7, %v2231_v23  ;;  %v2275_v3 = vsub.f32 %v1960_v8, %v2233_v32  ;;  %v2279_v29 = vsub.f32 %v1963_v9, %v2235_v19 }
  0x69   : > { %4294 = vst [vmem:[#allocation48_spill] sm:$0xff] %v2254_v55  ;;  %4295 = vst [vmem:[#allocation49_spill] sm:$0xff] %v2257_v33  ;;  %v2283_v4 = vsub.f32 %v1966_v10, %v2228_v61  ;;  %v2287_v5 = vsub.f32 %v1969_v11, %v2231_v23  ;;  %v2291_v7 = vsub.f32 %v1972_v12, %v2233_v32  ;;  %1419 = vpow2.f32 %v444_v6 }
  0x6a   : > { %4296 = vst [vmem:[#allocation50_spill] sm:$0xff] %v2261_v0  ;;  %4297 = vst [vmem:[#allocation51_spill] sm:$0xff] %v2264_v1  ;;  %v2295_v8 = vsub.f32 %v1979_v16, %v2235_v19  ;;  %v2299_v9 = vsub.f32 %v1982_v17, %v2228_v61  ;;  %v2303_v10 = vsub.f32 %v1985_v18, %v2231_v23 }
  0x6b   : > { %4298 = vst [vmem:[#allocation52_spill] sm:$0xff] %v2267_v2  ;;  %4299 = vst [vmem:[#allocation53_spill] sm:$0xff] %v2271_v40  ;;  %v2307_v11 = vsub.f32 %v1990_v20, %v2233_v32  ;;  %v2311_v12 = vsub.f32 %v1993_v21, %v2235_v19  ;;  %v2315_v16 = vsub.f32 %v1996_v22, %v2228_v61 }
  0x6c   : > { %4300 = vst [vmem:[#allocation54_spill] sm:$0xff] %v2275_v3  ;;  %4301 = vst [vmem:[#allocation55_spill] sm:$0xff] %v2279_v29  ;;  %v2319_v17 = vsub.f32 %v2002_v26, %v2231_v23  ;;  %v2323_v18 = vsub.f32 %v2005_v27, %v2233_v32  ;;  %v2327_v20 = vsub.f32 %v2008_v28, %v2235_v19 }
  0x6d   : > { %4302 = vst [vmem:[#allocation56_spill] sm:$0xff] %v2283_v4  ;;  %4303 = vst [vmem:[#allocation57_spill] sm:$0xff] %v2287_v5  ;;  %v2331_v21 = vsub.f32 %v2018_v34, %v2228_v61  ;;  %v2335_v22 = vsub.f32 %v2021_v35, %v2231_v23  ;;  %v2339_v26 = vsub.f32 %v2012_v30, %v2233_v32 }
  0x6e   : > { %4304 = vst [vmem:[#allocation58_spill] sm:$0xff] %v2291_v7  ;;  %4305 = vst [vmem:[#allocation59_spill] sm:$0xff] %v2295_v8  ;;  %v2343_v27 = vsub.f32 %v2024_v36, %v2235_v19  ;;  %v2347_v28 = vsub.f32 %v2034_v42, %v2228_v61  ;;  %v2351_v34 = vsub.f32 %v2037_v43, %v2231_v23 }
  0x6f   : > { %4306 = vst [vmem:[#allocation60_spill] sm:$0xff] %v2307_v11  ;;  %4307 = vst [vmem:[#allocation61_spill] sm:$0xff] %v2311_v12  ;;  %v2355_v35 = vsub.f32 %v2028_v38, %v2233_v32  ;;  %v2359_v30 = vsub.f32 %v2040_v44, %v2235_v19  ;;  %v2363_v36 = vsub.f32 %v2050_v50, %v2228_v61 }
  0x70   : > { %4308 = vst [vmem:[#allocation62_spill] sm:$0xff] %v2315_v16  ;;  %4309 = vst [vmem:[#allocation63_spill] sm:$0xff] %v2319_v17  ;;  %v2367_v42 = vsub.f32 %v2053_v51, %v2231_v23  ;;  %v2371_v43 = vsub.f32 %v2044_v46, %v2233_v32  ;;  %v2375_v38 = vsub.f32 %v2056_v52, %v2235_v19 }
  0x71   : > { %4310 = vst [vmem:[#allocation64_spill] sm:$0xff] %v2323_v18  ;;  %4311 = vst [vmem:[#allocation65_spill] sm:$0xff] %v2327_v20  ;;  %v2379_v44 = vsub.f32 %v2066_v58, %v2228_v61  ;;  %v2383_v50 = vsub.f32 %v2069_v59, %v2231_v23  ;;  %v2387_v51 = vsub.f32 %v2060_v54, %v2233_v32 }
  0x72   : > { %4312 = vst [vmem:[#allocation66_spill] sm:$0xff] %v2331_v21  ;;  %4313 = vst [vmem:[#allocation67_spill] sm:$0xff] %v2335_v22  ;;  %v2391_v46 = vsub.f32 %v2072_v60, %v2235_v19  ;;  %v2395_v52 = vsub.f32 %v2082_v13, %v2228_v61  ;;  %v2399_v58 = vsub.f32 %v2085_v14, %v2231_v23  ;;  %v446_v13 = vmul.f32 1.442695, %v2243_v41  ;;  %v4341_v41 = vld [vmem:[#allocation20_spill] sm:$0xff] }
  0x73   : > { %4314 = vst [vmem:[#allocation68_spill] sm:$0xff] %v2339_v26  ;;  %4315 = vst [vmem:[#allocation69_spill] sm:$0xff] %v2343_v27  ;;  %v2404_v59 = vsub.f32 %v2076_v62, %v2233_v32  ;;  %v2408_v54 = vsub.f32 %v2088_v15, %v2235_v19  ;;  %v2412_v60 = vsub.f32 %v2098_v31, %v2228_v61  ;;  %v4337_v62 = vld [vmem:[#allocation17_spill] sm:$0xff]  ;;  %v448_v15 = vmul.f32 1.442695, %v2250_v45  ;;  %v4347_v45 = vld [vmem:[#allocation23_spill] sm:$0xff] }
  0x74   : > { %4316 = vst [vmem:[#allocation70_spill] sm:$0xff] %v2347_v28  ;;  %4317 = vst [vmem:[#allocation71_spill] sm:$0xff] %v2351_v34  ;;  %v2417_v14 = vsub.f32 %v4333_v24, %v2231_v23  ;;  %v2421_v53 = vsub.f32 %v4335_v57, %v2233_v32  ;;  %v2425_v25 = vsub.f32 %v4337_v62, %v2235_v19  ;;  %v4343_v24 = vld [vmem:[#allocation18_spill] sm:$0xff]  ;;  %v450_v57 = vmul.f32 1.442695, %v2264_v1 }
  0x75   : > { %4318 = vst [vmem:[#allocation72_spill] sm:$0xff] %v2355_v35  ;;  %4319 = vst [vmem:[#allocation73_spill] sm:$0xff] %v2359_v30  ;;  %1421 = vpow2.f32 %v446_v13  ;;  %v454_v1 = vmul.f32 1.442695, %v2254_v55  ;;  %v458_v55 = vmul.f32 1.442695, %v2267_v2 }
  0x76   : > { %4320 = vst [vmem:[#allocation74_spill] sm:$0xff] %v2363_v36  ;;  %4321 = vst [vmem:[#allocation75_spill] sm:$0xff] %v2367_v42  ;;  %1423 = vpow2.f32 %v448_v15  ;;  %v462_v2 = vmul.f32 1.442695, %v2271_v40  ;;  %v468_v40 = vmul.f32 1.442695, %v2283_v4 }
  0x77   : > { %4322 = vst [vmem:[#allocation76_spill] sm:$0xff] %v2371_v43  ;;  %4323 = vst [vmem:[#allocation77_spill] sm:$0xff] %v2375_v38  ;;  %1425 = vpow2.f32 %v450_v57  ;;  %v4383_v4 = vld [vmem:[#allocation39_spill] sm:$0xff] }
  0x78   : > { %4324 = vst [vmem:[#allocation78_spill] sm:$0xff] %v2379_v44  ;;  %4325 = vst [vmem:[#allocation79_spill] sm:$0xff] %v2383_v50 }
  0x79   : > { %4326 = vst [vmem:[#allocation80_spill] sm:$0xff] %v2387_v51  ;;  %4327 = vst [vmem:[#allocation81_spill] sm:$0xff] %v2391_v46 }
  0x7a   : > { %4328 = vst [vmem:[#allocation82_spill] sm:$0xff] %v2395_v52  ;;  %4329 = vst [vmem:[#allocation83_spill] sm:$0xff] %v2399_v58 }
  0x7b   : > { %4330 = vst [vmem:[#allocation84_spill] sm:$0xff] %v2404_v59  ;;  %4331 = vst [vmem:[#allocation85_spill] sm:$0xff] %v2408_v54  ;;  %v4339_v54 = vld [vmem:[#allocation19_spill] sm:$0xff] }
  0x7c   : > { %4332 = vst [vmem:[#allocation86_spill] sm:$0xff] %v2412_v60  ;;  %4334 = vst [vmem:[#allocation16_spill] sm:$0xff] %v2417_v14  ;;  %v2430_v31 = vsub.f32 %v4339_v54, %v2228_v61  ;;  %v2434_v60 = vsub.f32 %v4341_v41, %v2231_v23  ;;  %v2438_v14 = vsub.f32 %v4343_v24, %v2233_v32  ;;  %v452_v54 = vmul.f32 1.442695, %v2247_v37  ;;  %v4349_v41 = vld [vmem:[#allocation24_spill] sm:$0xff]  ;;  %v4351_v24 = vld [vmem:[#allocation22_spill] sm:$0xff] }
  0x7d   : > { %4336 = vst [vmem:[#allocation15_spill] sm:$0xff] %v2421_v53  ;;  %4338 = vst [vmem:[#allocation17_spill] sm:$0xff] %v2425_v25  ;;  %v4345_v53 = vld [vmem:[#allocation21_spill] sm:$0xff]  ;;  %v2447_v25 = vsub.f32 %v4347_v45, %v2228_v61  ;;  %v4355_v45 = vld [vmem:[#allocation27_spill] sm:$0xff]  ;;  %v456_v37 = vmul.f32 1.442695, %v2257_v33 }
  0x7e   : > { %4340 = vst [vmem:[#allocation19_spill] sm:$0xff] %v2430_v31  ;;  %4342 = vst [vmem:[#allocation20_spill] sm:$0xff] %v2434_v60  ;;  %v2443_v62 = vsub.f32 %v4345_v53, %v2235_v19  ;;  %v2452_v60 = vsub.f32 %v4349_v41, %v2231_v23  ;;  %v4353_v53 = vld [vmem:[#allocation25_spill] sm:$0xff]  ;;  %v2465_v6 = vsub.f32 %v4355_v45, %v2228_v61  ;;  %v4357_v41 = vld [vmem:[#allocation28_spill] sm:$0xff]  ;;  %1427 = vpow2.f32 %v452_v54 }
  0x7f   : > { %4344 = vst [vmem:[#allocation18_spill] sm:$0xff] %v2438_v14  ;;  %4348 = vst [vmem:[#allocation23_spill] sm:$0xff] %v2447_v25  ;;  %v2456_v14 = vsub.f32 %v4351_v24, %v2233_v32  ;;  %v4359_v24 = vld [vmem:[#allocation26_spill] sm:$0xff]  ;;  %v4363_v45 = vld [vmem:[#allocation32_spill] sm:$0xff]  ;;  %v460_v33 = vmul.f32 1.442695, %v2261_v0  ;;  %1429 = vpow2.f32 %v454_v1 }
  0x80   : > { %4346 = vst [vmem:[#allocation21_spill] sm:$0xff] %v2443_v62  ;;  %4350 = vst [vmem:[#allocation24_spill] sm:$0xff] %v2452_v60  ;;  %v2461_v62 = vsub.f32 %v4353_v53, %v2235_v19  ;;  %v2470_v60 = vsub.f32 %v4357_v41, %v2231_v23  ;;  %v2474_v13 = vsub.f32 %v4359_v24, %v2233_v32  ;;  %v4361_v53 = vld [vmem:[#allocation29_spill] sm:$0xff]  ;;  %v4367_v24 = vld [vmem:[#allocation30_spill] sm:$0xff]  ;;  %1431 = vpow2.f32 %v456_v37 }
  0x81   : > { %4352 = vst [vmem:[#allocation22_spill] sm:$0xff] %v2456_v14  ;;  %4356 = vst [vmem:[#allocation27_spill] sm:$0xff] %v2465_v6  ;;  %v2483_v15 = vsub.f32 %v4363_v45, %v2228_v61  ;;  %v4365_v41 = vld [vmem:[#allocation33_spill] sm:$0xff]  ;;  %v2492_v57 = vsub.f32 %v4367_v24, %v2233_v32  ;;  %v4371_v45 = vld [vmem:[#allocation36_spill] sm:$0xff]  ;;  %v464_v0 = vmul.f32 1.442695, %v2275_v3  ;;  %1433 = vpow2.f32 %v458_v55 }
  0x82   : > { %4354 = vst [vmem:[#allocation25_spill] sm:$0xff] %v2461_v62  ;;  %4358 = vst [vmem:[#allocation28_spill] sm:$0xff] %v2470_v60  ;;  %v2479_v62 = vsub.f32 %v4361_v53, %v2235_v19  ;;  %v2488_v60 = vsub.f32 %v4365_v41, %v2231_v23  ;;  %v4369_v53 = vld [vmem:[#allocation31_spill] sm:$0xff]  ;;  %v2501_v54 = vsub.f32 %v4371_v45, %v2228_v61  ;;  %v4373_v41 = vld [vmem:[#allocation37_spill] sm:$0xff]  ;;  %1435 = vpow2.f32 %v460_v33 }
  0x83   : > { %4360 = vst [vmem:[#allocation26_spill] sm:$0xff] %v2474_v13  ;;  %4364 = vst [vmem:[#allocation32_spill] sm:$0xff] %v2483_v15  ;;  %v4375_v24 = vld [vmem:[#allocation34_spill] sm:$0xff]  ;;  %v2519_v37 = vsub.f32 %v2200_v47, %v2228_v61  ;;  %v470_v45 = vmul.f32 1.442695, %v2287_v5  ;;  %1437 = vpow2.f32 %v462_v2  ;;  %v2535_v47 = vsub.f32 %v4383_v4, %v2235_v19 }
  0x84   : > { %4362 = vst [vmem:[#allocation29_spill] sm:$0xff] %v2479_v62  ;;  %4366 = vst [vmem:[#allocation33_spill] sm:$0xff] %v2488_v60  ;;  %v2497_v62 = vsub.f32 %v4369_v53, %v2235_v19  ;;  %v2506_v60 = vsub.f32 %v4373_v41, %v2231_v23  ;;  %v2510_v1 = vsub.f32 %v4375_v24, %v2233_v32  ;;  %v4377_v53 = vld [vmem:[#allocation35_spill] sm:$0xff]  ;;  %v4381_v24 = vld [vmem:[#allocation38_spill] sm:$0xff]  ;;  %v466_v3 = vmul.f32 1.442695, %v2279_v29 }
  0x85   : > { %4368 = vst [vmem:[#allocation30_spill] sm:$0xff] %v2492_v57  ;;  %4372 = vst [vmem:[#allocation36_spill] sm:$0xff] %v2501_v54  ;;  %v2524_v41 = vsub.f32 %v2203_v48, %v2231_v23  ;;  %v2528_v55 = vsub.f32 %v4381_v24, %v2233_v32  ;;  %v2539_v33 = vsub.f32 %v2220_v56, %v2228_v61  ;;  %1439 = vpow2.f32 %v464_v0 }
  0x86   : > { %4370 = vst [vmem:[#allocation31_spill] sm:$0xff] %v2497_v62  ;;  %4374 = vst [vmem:[#allocation37_spill] sm:$0xff] %v2506_v60  ;;  %v2515_v62 = vsub.f32 %v4377_v53, %v2235_v19  ;;  %v2531_v53 = vpop.eup %1419  ;;  %v476_v48 = vmul.f32 1.442695, %v2299_v9  ;;  %v2546_v2 = vsub.f32 %v2223_v49, %v2231_v23  ;;  %v2550_v24 = vsub.f32 %v2210_v39, %v2233_v32 }
  0x87   : > { %4376 = vst [vmem:[#allocation34_spill] sm:$0xff] %v2510_v1  ;;  %4379 = vst [vmem:[#allocation87_spill] sm:$0xff] %v2519_v37  ;;  %v2542_v5 = vpop.eup %1421  ;;  %1441 = vpow2.f32 %v468_v40  ;;  %v478_v4 = vmul.f32 1.442695, %v2303_v10  ;;  %v2557_v56 = vsub.f32 %v2215_v63, %v2235_v19  ;;  %v472_v0 = vmul.f32 1.442695, %v2291_v7 }
  0x88   : > { %4378 = vst [vmem:[#allocation35_spill] sm:$0xff] %v2515_v62  ;;  %4380 = vst [vmem:[#allocation88_spill] sm:$0xff] %v2524_v41  ;;  %v2553_v29 = vpop.eup %1423  ;;  %1443 = vpow2.f32 %v470_v45  ;;  %v474_v61 = vmul.f32 1.442695, %v2295_v8  ;;  %v480_v39 = vmul.f32 1.442695, %v2307_v11 }
  0x89   : > { %4382 = vst [vmem:[#allocation38_spill] sm:$0xff] %v2528_v55  ;;  %4384 = vst [vmem:[#allocation39_spill] sm:$0xff] %v2535_v47  ;;  %v2561_v49 = vpop.eup %1425  ;;  %1445 = vpow2.f32 %v466_v3  ;;  %v482_v40 = vmul.f32 1.442695, %v2311_v12  ;;  %v484_v32 = vmul.f32 1.442695, %v2315_v16 }
  0x8a   : > { %4385 = vst [vmem:[#allocation89_spill] sm:$0xff] %v2539_v33  ;;  %4386 = vst [vmem:[#allocation90_spill] sm:$0xff] %v2546_v2  ;;  %v2566_v23 = vpop.eup %1427  ;;  %1447 = vpow2.f32 %v476_v48  ;;  %v486_v63 = vmul.f32 1.442695, %v2319_v17  ;;  %v488_v45 = vmul.f32 1.442695, %v2323_v18 }
  0x8b   : > { %4387 = vst [vmem:[#allocation91_spill] sm:$0xff] %v2550_v24  ;;  %4388 = vst [vmem:[#allocation92_spill] sm:$0xff] %v2553_v29  ;;  %v490_v19 = vmul.f32 1.442695, %v2327_v20  ;;  %v2571_v7 = vpop.eup %1429  ;;  %1449 = vpow2.f32 %v478_v4  ;;  %v492_v3 = vmul.f32 1.442695, %v2331_v21 }
  0x8c   : > { %4389 = vst [vmem:[#allocation93_spill] sm:$0xff] %v2557_v56  ;;  %4390 = vst [vmem:[#allocation94_spill] sm:$0xff] %v2561_v49  ;;  %v494_v11 = vmul.f32 1.442695, %v2335_v22  ;;  %v496_v12 = vmul.f32 1.442695, %v2339_v26  ;;  %v2576_v8 = vpop.eup %1431  ;;  %1451 = vpow2.f32 %v472_v0 }
  0x8d   : > { %4391 = vst [vmem:[#allocation95_spill] sm:$0xff] %v2576_v8  ;;  %v2579_v48 = vmul.f32 1.442695, %v2343_v27  ;;  %v500_v56 = vmul.f32 1.442695, %v2347_v28  ;;  %v2583_v20 = vpop.eup %1433  ;;  %1453 = vpow2.f32 %v474_v61 }
  0x8e   : > { %v502_v18 = vmul.f32 1.442695, %v2351_v34  ;;  %4392 = vst [vmem:[#allocation96_spill] sm:$0xff] %v2583_v20  ;;  %v2586_v4 = vmul.f32 1.442695, %v2355_v35  ;;  %v2592_v2 = vpop.eup %1435  ;;  %1455 = vpow2.f32 %v484_v32  ;;  %v650_v17 = vadd.f32 %v2583_v20, %v2561_v49  ;;  %v4404_v49 = vld [vmem:[#allocation20_spill] sm:$0xff] }
  0x8f   : > { %v2589_v24 = vmul.f32 1.442695, %v2359_v30  ;;  %v508_v26 = vmul.f32 1.442695, %v2363_v36  ;;  %v2595_v0 = vmul.f32 1.442695, %v2367_v42  ;;  %v2603_v61 = vpop.eup %1437  ;;  %1457 = vpow2.f32 %v486_v63 }
  0x90   : > { %v2598_v27 = vmul.f32 1.442695, %v2371_v43  ;;  %v2601_v34 = vmul.f32 1.442695, %v2375_v38  ;;  %v2606_v30 = vmul.f32 1.442695, %v2379_v44  ;;  %v2614_v42 = vpop.eup %1439  ;;  %1459 = vpow2.f32 %v480_v39 }
  0x91   : > { %v2609_v35 = vmul.f32 1.442695, %v2383_v50  ;;  %v2612_v32 = vmul.f32 1.442695, %v2387_v51  ;;  %4393 = vst [vmem:[#allocation97_spill] sm:$0xff] %v2614_v42  ;;  %v2625_v44 = vpop.eup %1441  ;;  %1461 = vpow2.f32 %v482_v40  ;;  %v596_v51 = vadd.f32 %v2566_v23, %v2531_v53 }
  0x92   : > { %v2617_v43 = vmul.f32 1.442695, %v2391_v46  ;;  %v2620_v38 = vmul.f32 1.442695, %v2395_v52  ;;  %v2623_v63 = vmul.f32 1.442695, %v2399_v58  ;;  %v614_v39 = vadd.f32 %v2571_v7, %v2542_v5  ;;  %v2634_v46 = vpop.eup %1443 }
  0x93   : > { %v2628_v50 = vmul.f32 1.442695, %v2404_v59  ;;  %1463 = vpow2.f32 %v492_v3  ;;  %v4394_v52 = vld [vmem:[#allocation85_spill] sm:$0xff]  ;;  %v4396_v58 = vld [vmem:[#allocation86_spill] sm:$0xff]  ;;  %v632_v40 = vadd.f32 %v2576_v8, %v2553_v29  ;;  %v2644_v59 = vpop.eup %1445  ;;  %v597_v22 = vadd.f32 %v2592_v2, %v596_v51 }
  0x94   : > { %v2637_v36 = vmul.f32 1.442695, %v4394_v52  ;;  %v2640_v28 = vmul.f32 1.442695, %v4396_v58  ;;  %4397 = vst [vmem:[#allocation99_spill] sm:$0xff] %v2644_v59  ;;  %1465 = vpow2.f32 %v494_v11  ;;  %v615_v21 = vadd.f32 %v2603_v61, %v614_v39  ;;  %v2650_v3 = vpop.eup %1447  ;;  %v4398_v52 = vld [vmem:[#allocation16_spill] sm:$0xff] }
  0x95   : > { %1467 = vpow2.f32 %v488_v45  ;;  %v2653_v16 = vmul.f32 1.442695, %v4398_v52  ;;  %v4399_v58 = vld [vmem:[#allocation15_spill] sm:$0xff]  ;;  %v4401_v8 = vld [vmem:[#allocation17_spill] sm:$0xff]  ;;  %v2661_v11 = vpop.eup %1449  ;;  %v2664_v51 = vmul.f32 1.442695, %v2430_v31  ;;  %v598_v39 = vadd.f32 %v2625_v44, %v597_v22 }
  0x96   : > { %4395 = vst [vmem:[#allocation98_spill] sm:$0xff] %v2637_v36  ;;  %v2656_v36 = vmul.f32 1.442695, %v4399_v58  ;;  %v2659_v29 = vmul.f32 1.442695, %v4401_v8  ;;  %1469 = vpow2.f32 %v490_v19  ;;  %v616_v20 = vadd.f32 %v2634_v46, %v615_v21  ;;  %v2668_v45 = vpop.eup %1451  ;;  %v4405_v58 = vld [vmem:[#allocation18_spill] sm:$0xff] }
  0x97   : > { %4403 = vst [vmem:[#allocation102_spill] sm:$0xff] %v2668_v45  ;;  %1471 = vpow2.f32 %v500_v56  ;;  %v2671_v52 = vmul.f32 1.442695, %v4404_v49  ;;  %v633_v8 = vadd.f32 %v2614_v42, %v632_v40  ;;  %v599_v19 = vadd.f32 %v2650_v3, %v598_v39  ;;  %v4408_v56 = vld [vmem:[#allocation21_spill] sm:$0xff] }
  0x98   : > { %4400 = vst [vmem:[#allocation100_spill] sm:$0xff] %v2656_v36  ;;  %4402 = vst [vmem:[#allocation101_spill] sm:$0xff] %v2659_v29  ;;  %v2674_v36 = vmul.f32 1.442695, %v4405_v58  ;;  %v2677_v29 = vpop.eup %1453  ;;  %1473 = vpow2.f32 %v502_v18  ;;  %v617_v22 = vadd.f32 %v2661_v11, %v616_v20  ;;  %v651_v21 = vadd.f32 %v2644_v59, %v650_v17  ;;  %v4410_v17 = vld [vmem:[#allocation25_spill] sm:$0xff] }
  0x99   : > { %4407 = vst [vmem:[#allocation104_spill] sm:$0xff] %v2677_v29  ;;  %v2682_v31 = vpop.eup %1455  ;;  %1475 = vpow2.f32 %v496_v12  ;;  %v2685_v49 = vmul.f32 1.442695, %v4408_v56  ;;  %v2688_v58 = vmul.f32 1.442695, %v2447_v25  ;;  %v634_v25 = vadd.f32 %v2668_v45, %v633_v8  ;;  %v4416_v45 = vld [vmem:[#allocation33_spill] sm:$0xff] }
  0x9a   : > { %4406 = vst [vmem:[#allocation103_spill] sm:$0xff] %v2674_v36  ;;  %v4409_v36 = vld [vmem:[#allocation24_spill] sm:$0xff]  ;;  %v2693_v42 = vpop.eup %1457  ;;  %1477 = vpow2.f32 %v2579_v48  ;;  %v2697_v18 = vmul.f32 1.442695, %v2456_v14  ;;  %v2700_v20 = vmul.f32 1.442695, %v4410_v17  ;;  %v600_v12 = vadd.f32 %v2682_v31, %v599_v19 }
  0x9b   : > { %v2691_v40 = vmul.f32 1.442695, %v4409_v36  ;;  %v2703_v39 = vpop.eup %1459  ;;  %1479 = vpow2.f32 %v508_v26  ;;  %v2706_v56 = vmul.f32 1.442695, %v2465_v6  ;;  %v618_v36 = vadd.f32 %v2693_v42, %v617_v22  ;;  %v4413_v48 = vld [vmem:[#allocation28_spill] sm:$0xff]  ;;  %v4414_v6 = vld [vmem:[#allocation29_spill] sm:$0xff] }
  0x9c   : > { %4411 = vst [vmem:[#allocation105_spill] sm:$0xff] %v2703_v39  ;;  %v2710_v59 = vpop.eup %1461  ;;  %1481 = vpow2.f32 %v2595_v0  ;;  %v2714_v14 = vmul.f32 1.442695, %v4413_v48  ;;  %v2717_v17 = vmul.f32 1.442695, %v2474_v13  ;;  %v652_v19 = vadd.f32 %v2677_v29, %v651_v21  ;;  %v4417_v21 = vld [vmem:[#allocation31_spill] sm:$0xff] }
  0x9d   : > { %4412 = vst [vmem:[#allocation106_spill] sm:$0xff] %v2710_v59  ;;  %v2720_v26 = vpop.eup %1463  ;;  %1483 = vpow2.f32 %v2586_v4  ;;  %v2724_v22 = vmul.f32 1.442695, %v4414_v6  ;;  %v2727_v8 = vmul.f32 1.442695, %v2483_v15 }
  0x9e   : > { %v2730_v0 = vmul.f32 1.442695, %v4416_v45  ;;  %v2732_v48 = vpop.eup %1465  ;;  %1485 = vpow2.f32 %v2589_v24  ;;  %v2736_v13 = vmul.f32 1.442695, %v2492_v57  ;;  %v2739_v29 = vmul.f32 1.442695, %v4417_v21 }
  0x9f   : > { %4415 = vst [vmem:[#allocation107_spill] sm:$0xff] %v2724_v22  ;;  %v601_v4 = vadd.f32 %v2720_v26, %v600_v12  ;;  %v2742_v6 = vpop.eup %1467  ;;  %1487 = vpow2.f32 %v2606_v30  ;;  %v2746_v15 = vmul.f32 1.442695, %v2501_v54  ;;  %v619_v45 = vadd.f32 %v2732_v48, %v618_v36  ;;  %v4420_v54 = vld [vmem:[#allocation44_spill] sm:$0xff] }
  0xa0   : > { %v635_v22 = vadd.f32 %v2703_v39, %v634_v25  ;;  %v2750_v24 = vpop.eup %1469  ;;  %1489 = vpow2.f32 %v2609_v35  ;;  %v2754_v21 = vmul.f32 1.442695, %v2506_v60  ;;  %v2757_v12 = vmul.f32 1.442695, %v2510_v1 }
  0xa1   : > { %4418 = vst [vmem:[#allocation108_spill] sm:$0xff] %v2750_v24  ;;  %v653_v57 = vadd.f32 %v2710_v59, %v652_v19  ;;  %v2760_v30 = vpop.eup %1471  ;;  %1491 = vpow2.f32 %v2598_v27  ;;  %v2764_v36 = vmul.f32 1.442695, %v2515_v62  ;;  %v2767_v25 = vmul.f32 1.442695, %v2519_v37  ;;  %v4421_v59 = vld [vmem:[#allocation46_spill] sm:$0xff] }
  0xa2   : > { %v2770_v35 = vmul.f32 1.442695, %v2524_v41  ;;  %v2772_v60 = vpop.eup %1473  ;;  %1493 = vpow2.f32 %v2601_v34  ;;  %v2776_v1 = vmul.f32 1.442695, %v2528_v55  ;;  %v602_v19 = vadd.f32 %v2760_v30, %v601_v4  ;;  %v4422_v55 = vld [vmem:[#allocation45_spill] sm:$0xff] }
  0xa3   : > { %v676_v27 = vmul.f32 %v2531_v53, %v4420_v54  ;;  %v2781_v62 = vpop.eup %1475  ;;  %1495 = vpow2.f32 %v2620_v38  ;;  %v620_v37 = vadd.f32 %v2772_v60, %v619_v45  ;;  %v636_v41 = vadd.f32 %v2742_v6, %v635_v22  ;;  %v4423_v53 = vld [vmem:[#allocation48_spill] sm:$0xff] }
  0xa4   : > { %4419 = vst [vmem:[#allocation109_spill] sm:$0xff] %v2776_v1  ;;  %v680_v39 = vmul.f32 %v2566_v23, %v4421_v59  ;;  %v2788_v34 = vpop.eup %1477  ;;  %1497 = vpow2.f32 %v2623_v63  ;;  %v654_v4 = vadd.f32 %v2750_v24, %v653_v57  ;;  %v677_v54 = vmul.f32 %v2542_v5, %v4422_v55  ;;  %v4425_v59 = vld [vmem:[#allocation50_spill] sm:$0xff]  ;;  %v4426_v5 = vld [vmem:[#allocation53_spill] sm:$0xff] }
  0xa5   : > { %v681_v1 = vmul.f32 %v2571_v7, %v4423_v53  ;;  %v1480_v38 = vpop.eup %1479  ;;  %1499 = vpow2.f32 %v2612_v32  ;;  %v2798_v45 = vmul.f32 1.442695, %v2535_v47  ;;  %v2801_v23 = vmul.f32 1.442695, %v2539_v33  ;;  %v4427_v7 = vld [vmem:[#allocation56_spill] sm:$0xff] }
  0xa6   : > { %v684_v63 = vmul.f32 %v2592_v2, %v4425_v59  ;;  %v1482_v22 = vpop.eup %1481  ;;  %1501 = vpow2.f32 %v2617_v43  ;;  %v603_v57 = vadd.f32 %v1480_v38, %v602_v19  ;;  %v685_v55 = vmul.f32 %v2603_v61, %v4426_v5  ;;  %v4428_v2 = vld [vmem:[#allocation57_spill] sm:$0xff] }
  0xa7   : > { %4424 = vst [vmem:[#allocation44_spill] sm:$0xff] %v2798_v45  ;;  %v688_v53 = vmul.f32 %v2625_v44, %v4427_v7  ;;  %v2810_v32 = vpop.eup %1483  ;;  %1503 = vpow2.f32 %v2640_v28  ;;  %v621_v47 = vadd.f32 %v1482_v22, %v620_v37  ;;  %v637_v33 = vadd.f32 %v2781_v62, %v636_v41 }
  0xa8   : > { %v752_v24 = vadd.f32 %v680_v39, %v676_v27  ;;  %v2814_v45 = vpop.eup %1485  ;;  %1505 = vpow2.f32 %v2653_v16  ;;  %v655_v43 = vadd.f32 %v2788_v34, %v654_v4  ;;  %v689_v61 = vmul.f32 %v2634_v46, %v4428_v2  ;;  %v4429_v39 = vld [vmem:[#allocation98_spill] sm:$0xff] }
  0xa9   : > { %v770_v19 = vadd.f32 %v681_v1, %v677_v54  ;;  %v1488_v59 = vpop.eup %1487  ;;  %1507 = vpow2.f32 %v2628_v50  ;;  %v692_v28 = vmul.f32 %v2650_v3, %v2299_v9  ;;  %v693_v44 = vmul.f32 %v2661_v11, %v2303_v10  ;;  %v4430_v27 = vld [vmem:[#allocation62_spill] sm:$0xff]  ;;  %v4431_v11 = vld [vmem:[#allocation63_spill] sm:$0xff] }
  0xaa   : > { %v753_v37 = vadd.f32 %v752_v24, %v684_v63  ;;  %v1490_v41 = vpop.eup %1489  ;;  %1509 = vpow2.f32 %v4429_v39  ;;  %v604_v16 = vadd.f32 %v1488_v59, %v603_v57  ;;  %v696_v4 = vmul.f32 %v2682_v31, %v4430_v27  ;;  %v4432_v63 = vld [vmem:[#allocation100_spill] sm:$0xff]  ;;  %v4433_v57 = vld [vmem:[#allocation66_spill] sm:$0xff] }
  0xab   : > { %v771_v5 = vadd.f32 %v770_v19, %v685_v55  ;;  %v2828_v46 = vpop.eup %1491  ;;  %1511 = vpow2.f32 %v2664_v51  ;;  %v622_v50 = vadd.f32 %v1490_v41, %v621_v47  ;;  %v638_v1 = vadd.f32 %v2810_v32, %v637_v33  ;;  %v4434_v47 = vld [vmem:[#allocation67_spill] sm:$0xff]  ;;  %v4436_v2 = vld [vmem:[#allocation70_spill] sm:$0xff] }
  0xac   : > { %v754_v9 = vadd.f32 %v753_v37, %v688_v53  ;;  %v2832_v3 = vpop.eup %1493  ;;  %1513 = vpow2.f32 %v2671_v52  ;;  %v656_v10 = vadd.f32 %v2814_v45, %v655_v43  ;;  %v697_v24 = vmul.f32 %v2693_v42, %v4431_v11  ;;  %v4435_v53 = vld [vmem:[#allocation101_spill] sm:$0xff] }
  0xad   : > { %v772_v54 = vadd.f32 %v771_v5, %v689_v61  ;;  %v1496_v31 = vpop.eup %1495  ;;  %1515 = vpow2.f32 %v4432_v63  ;;  %v700_v51 = vmul.f32 %v2720_v26, %v4433_v57  ;;  %v701_v33 = vmul.f32 %v2732_v48, %v4434_v47  ;;  %v4439_v5 = vld [vmem:[#allocation74_spill] sm:$0xff] }
  0xae   : > { %v755_v55 = vadd.f32 %v754_v9, %v692_v28  ;;  %v1498_v7 = vpop.eup %1497  ;;  %1517 = vpow2.f32 %v4435_v53  ;;  %v605_v52 = vadd.f32 %v1496_v31, %v604_v16  ;;  %v704_v43 = vmul.f32 %v2760_v30, %v4436_v2  ;;  %v4437_v28 = vld [vmem:[#allocation71_spill] sm:$0xff] }
  0xaf   : > { %v773_v19 = vadd.f32 %v772_v54, %v693_v44  ;;  %v2846_v42 = vpop.eup %1499  ;;  %1519 = vpow2.f32 %v2688_v58  ;;  %v623_v61 = vadd.f32 %v1498_v7, %v622_v50  ;;  %v639_v37 = vadd.f32 %v2828_v46, %v638_v1  ;;  %v4438_v44 = vld [vmem:[#allocation103_spill] sm:$0xff]  ;;  %v4441_v54 = vld [vmem:[#allocation78_spill] sm:$0xff] }
  0xb0   : > { %v756_v26 = vadd.f32 %v755_v55, %v696_v4  ;;  %v2850_v39 = vpop.eup %1501  ;;  %1521 = vpow2.f32 %v2691_v40  ;;  %v657_v48 = vadd.f32 %v2832_v3, %v656_v10  ;;  %v705_v16 = vmul.f32 %v2772_v60, %v4437_v28  ;;  %v4440_v58 = vld [vmem:[#allocation75_spill] sm:$0xff] }
  0xb1   : > { %v774_v27 = vadd.f32 %v773_v19, %v697_v24  ;;  %v1504_v30 = vpop.eup %1503  ;;  %1523 = vpow2.f32 %v4438_v44  ;;  %v708_v9 = vmul.f32 %v1480_v38, %v4439_v5  ;;  %v709_v50 = vmul.f32 %v1482_v22, %v4440_v58  ;;  %v4442_v22 = vld [vmem:[#allocation79_spill] sm:$0xff] }
  0xb2   : > { %v757_v11 = vadd.f32 %v756_v26, %v700_v51  ;;  %v1506_v1 = vpop.eup %1505  ;;  %1525 = vpow2.f32 %v2685_v49  ;;  %v606_v4 = vadd.f32 %v1504_v30, %v605_v52  ;;  %v712_v40 = vmul.f32 %v1488_v59, %v4441_v54  ;;  %v4443_v59 = vld [vmem:[#allocation90_spill] sm:$0xff]  ;;  %v4445_v19 = vld [vmem:[#allocation83_spill] sm:$0xff] }
  0xb3   : > { %v775_v63 = vadd.f32 %v774_v27, %v701_v33  ;;  %v2861_v10 = vpop.eup %1507  ;;  %1527 = vpow2.f32 %v2706_v56  ;;  %v624_v60 = vadd.f32 %v1506_v1, %v623_v61  ;;  %v640_v24 = vadd.f32 %v2846_v42, %v639_v37  ;;  %v4444_v56 = vld [vmem:[#allocation82_spill] sm:$0xff] }
  0xb4   : > { %v758_v57 = vadd.f32 %v757_v11, %v704_v43  ;;  %v2865_v47 = vpop.eup %1509  ;;  %1529 = vpow2.f32 %v2714_v14  ;;  %v658_v38 = vadd.f32 %v2850_v39, %v657_v48  ;;  %v713_v49 = vmul.f32 %v1490_v41, %v4442_v22  ;;  %v4447_v27 = vld [vmem:[#allocation86_spill] sm:$0xff]  ;;  %v4450_v11 = vld [vmem:[#allocation93_spill] sm:$0xff] }
  0xb5   : > { %v776_v51 = vadd.f32 %v775_v63, %v705_v16  ;;  %v1512_v55 = vpop.eup %1511  ;;  %1531 = vpow2.f32 %v2697_v18  ;;  %v2872_v33 = vmul.f32 1.442695, %v4443_v59  ;;  %v716_v53 = vmul.f32 %v1496_v31, %v4444_v56  ;;  %v4446_v31 = vld [vmem:[#allocation91_spill] sm:$0xff]  ;;  %v4454_v22 = vld [vmem:[#allocation94_spill] sm:$0xff] }
  0xb6   : > { %v759_v52 = vadd.f32 %v758_v57, %v708_v9  ;;  %v1514_v2 = vpop.eup %1513  ;;  %1533 = vpow2.f32 %v2700_v20  ;;  %v607_v43 = vadd.f32 %v1512_v55, %v606_v4  ;;  %v717_v14 = vmul.f32 %v1498_v7, %v4445_v19 }
  0xb7   : > { %v777_v61 = vadd.f32 %v776_v51, %v709_v50  ;;  %v2877_v37 = vpop.eup %1515  ;;  %1535 = vpow2.f32 %v2727_v8  ;;  %v625_v41 = vadd.f32 %v1514_v2, %v624_v60  ;;  %v641_v18 = vadd.f32 %v2861_v10, %v640_v24  ;;  %v4448_v8 = vld [vmem:[#allocation16_spill] sm:$0xff]  ;;  %v4449_v50 = vld [vmem:[#allocation107_spill] sm:$0xff] }
  0xb8   : > { %v760_v26 = vadd.f32 %v759_v52, %v712_v40  ;;  %v2881_v48 = vpop.eup %1517  ;;  %1537 = vpow2.f32 %v2730_v0  ;;  %v2885_v28 = vmul.f32 1.442695, %v4446_v31  ;;  %v659_v20 = vadd.f32 %v2865_v47, %v658_v38  ;;  %v4451_v60 = vld [vmem:[#allocation47_spill] sm:$0xff] }
  0xb9   : > { %v778_v16 = vadd.f32 %v777_v61, %v713_v49  ;;  %v1520_v7 = vpop.eup %1519  ;;  %1539 = vpow2.f32 %v2717_v17  ;;  %v720_v44 = vmul.f32 %v1504_v30, %v4447_v27  ;;  %v721_v5 = vmul.f32 %v1506_v1, %v4448_v8  ;;  %v4452_v30 = vld [vmem:[#allocation92_spill] sm:$0xff]  ;;  %v4453_v38 = vld [vmem:[#allocation51_spill] sm:$0xff] }
  0xba   : > { %v761_v9 = vadd.f32 %v760_v26, %v716_v53  ;;  %v1522_v58 = vpop.eup %1521  ;;  %1541 = vpow2.f32 %v4449_v50  ;;  %v2893_v4 = vmul.f32 1.442695, %v4450_v11  ;;  %v608_v0 = vadd.f32 %v1520_v7, %v607_v43  ;;  %v4455_v51 = vld [vmem:[#allocation19_spill] sm:$0xff]  ;;  %v4459_v26 = vld [vmem:[#allocation52_spill] sm:$0xff] }
  0xbb   : > { %v779_v54 = vadd.f32 %v778_v16, %v717_v14  ;;  %v2895_v40 = vpop.eup %1523  ;;  %1543 = vpow2.f32 %v2746_v15  ;;  %v626_v63 = vadd.f32 %v1522_v58, %v625_v41  ;;  %v642_v17 = vadd.f32 %v2877_v37, %v641_v18  ;;  %v4456_v15 = vld [vmem:[#allocation20_spill] sm:$0xff]  ;;  %v4457_v41 = vld [vmem:[#allocation49_spill] sm:$0xff]  ;;  %v4464_v50 = vld [vmem:[#allocation99_spill] sm:$0xff] }
  0xbc   : > { %v678_v24 = vmul.f32 %v4452_v30, %v4451_v60  ;;  %v2901_v1 = vpop.eup %1525  ;;  %1545 = vpow2.f32 %v2754_v21  ;;  %v660_v57 = vadd.f32 %v2881_v48, %v659_v20  ;;  %v679_v49 = vmul.f32 %v4454_v22, %v4453_v38  ;;  %v4458_v21 = vld [vmem:[#allocation95_spill] sm:$0xff]  ;;  %v4460_v20 = vld [vmem:[#allocation96_spill] sm:$0xff] }
  0xbd   : > { %v724_v56 = vmul.f32 %v1512_v55, %v4455_v51  ;;  %v1528_v53 = vpop.eup %1527  ;;  %1547 = vpow2.f32 %v2736_v13  ;;  %v725_v52 = vmul.f32 %v1514_v2, %v4456_v15  ;;  %v762_v43 = vadd.f32 %v761_v9, %v720_v44  ;;  %v4461_v2 = vld [vmem:[#allocation54_spill] sm:$0xff]  ;;  %v4462_v44 = vld [vmem:[#allocation97_spill] sm:$0xff]  ;;  %v4463_v9 = vld [vmem:[#allocation55_spill] sm:$0xff] }
  0xbe   : > { %v780_v19 = vadd.f32 %v779_v54, %v721_v5  ;;  %v1530_v14 = vpop.eup %1529  ;;  %1549 = vpow2.f32 %v2739_v29  ;;  %v609_v61 = vadd.f32 %v1528_v53, %v608_v0  ;;  %v682_v18 = vmul.f32 %v4458_v21, %v4457_v41  ;;  %v4465_v54 = vld [vmem:[#allocation23_spill] sm:$0xff]  ;;  %v4467_v15 = vld [vmem:[#allocation58_spill] sm:$0xff]  ;;  %v4470_v21 = vld [vmem:[#allocation104_spill] sm:$0xff] }
  0xbf   : > { %v683_v16 = vmul.f32 %v4460_v20, %v4459_v26  ;;  %v2915_v27 = vpop.eup %1531  ;;  %1551 = vpow2.f32 %v2767_v25  ;;  %v627_v55 = vadd.f32 %v1530_v14, %v626_v63  ;;  %v643_v13 = vadd.f32 %v2895_v40, %v642_v17  ;;  %v4466_v25 = vld [vmem:[#allocation24_spill] sm:$0xff] }
  0xc0   : > { %v686_v8 = vmul.f32 %v4462_v44, %v4461_v2  ;;  %v2921_v5 = vpop.eup %1533  ;;  %1553 = vpow2.f32 %v2770_v35  ;;  %v661_v29 = vadd.f32 %v2901_v1, %v660_v57  ;;  %v687_v0 = vmul.f32 %v4464_v50, %v4463_v9  ;;  %v4468_v35 = vld [vmem:[#allocation102_spill] sm:$0xff]  ;;  %v4469_v57 = vld [vmem:[#allocation59_spill] sm:$0xff] }
  0xc1   : > { %v728_v60 = vmul.f32 %v1520_v7, %v4465_v54  ;;  %v1536_v30 = vpop.eup %1535  ;;  %1555 = vpow2.f32 %v2757_v12  ;;  %v729_v63 = vmul.f32 %v1522_v58, %v4466_v25  ;;  %v763_v17 = vadd.f32 %v762_v43, %v724_v56  ;;  %v4472_v43 = vld [vmem:[#allocation105_spill] sm:$0xff]  ;;  %v4474_v2 = vld [vmem:[#allocation106_spill] sm:$0xff]  ;;  %v4475_v50 = vld [vmem:[#allocation27_spill] sm:$0xff] }
  0xc2   : > { %v781_v38 = vadd.f32 %v780_v19, %v725_v52  ;;  %v1538_v22 = vpop.eup %1537  ;;  %1557 = vpow2.f32 %v2764_v36  ;;  %v610_v51 = vadd.f32 %v1536_v30, %v609_v61  ;;  %v690_v41 = vmul.f32 %v4468_v35, %v4467_v15  ;;  %v4471_v52 = vld [vmem:[#allocation60_spill] sm:$0xff]  ;;  %v4473_v61 = vld [vmem:[#allocation61_spill] sm:$0xff] }
  0xc3   : > { %v691_v26 = vmul.f32 %v4470_v21, %v4469_v57  ;;  %v2935_v20 = vpop.eup %1539  ;;  %1559 = vpow2.f32 %v2801_v23  ;;  %v628_v7 = vadd.f32 %v1538_v22, %v627_v55  ;;  %v644_v12 = vadd.f32 %v2915_v27, %v643_v13  ;;  %v4476_v23 = vld [vmem:[#allocation28_spill] sm:$0xff] }
  0xc4   : > { %v788_v58 = vadd.f32 %v682_v18, %v678_v24  ;;  %v2939_v56 = vpop.eup %1541  ;;  %1561 = vpow2.f32 %v2872_v33  ;;  %v662_v36 = vadd.f32 %v2921_v5, %v661_v29  ;;  %v694_v19 = vmul.f32 %v4472_v43, %v4471_v52  ;;  %v4477_v18 = vld [vmem:[#allocation109_spill] sm:$0xff]  ;;  %v4478_v33 = vld [vmem:[#allocation64_spill] sm:$0xff] }
  0xc5   : > { %v695_v44 = vmul.f32 %v4474_v2, %v4473_v61  ;;  %v1544_v9 = vpop.eup %1543  ;;  %v732_v54 = vmul.f32 %v1528_v53, %v4475_v50  ;;  %v733_v55 = vmul.f32 %v1530_v14, %v4476_v23  ;;  %v764_v25 = vadd.f32 %v763_v17, %v728_v60  ;;  %v4479_v21 = vld [vmem:[#allocation44_spill] sm:$0xff]  ;;  %v4480_v60 = vld [vmem:[#allocation65_spill] sm:$0xff] }
  0xc6   : > { %v782_v13 = vadd.f32 %v781_v38, %v729_v63  ;;  %v1546_v24 = vpop.eup %1545  ;;  %1563 = vpow2.f32 %v4477_v18  ;;  %v611_v15 = vadd.f32 %v1544_v9, %v610_v51  ;;  %v698_v29 = vmul.f32 %v2742_v6, %v4478_v33  ;;  %v4481_v63 = vld [vmem:[#allocation108_spill] sm:$0xff] }
  0xc7   : > { %v789_v35 = vadd.f32 %v788_v58, %v686_v8  ;;  %v2952_v57 = vpop.eup %1547  ;;  %1565 = vpow2.f32 %v4479_v21  ;;  %v629_v52 = vadd.f32 %v1546_v24, %v628_v7  ;;  %v645_v43 = vadd.f32 %v2935_v20, %v644_v12  ;;  %v4482_v38 = vld [vmem:[#allocation68_spill] sm:$0xff] }
  0xc8   : > { %v806_v53 = vadd.f32 %v683_v16, %v679_v49  ;;  %v2956_v61 = vpop.eup %1549  ;;  %v663_v14 = vadd.f32 %v2939_v56, %v662_v36  ;;  %v699_v17 = vmul.f32 %v4481_v63, %v4480_v60  ;;  %v702_v51 = vmul.f32 %v2781_v62, %v4482_v38  ;;  %v4483_v58 = vld [vmem:[#allocation32_spill] sm:$0xff]  ;;  %v4484_v16 = vld [vmem:[#allocation33_spill] sm:$0xff] }
  0xc9   : > { %v790_v6 = vadd.f32 %v789_v35, %v690_v41  ;;  %v1552_v8 = vpop.eup %1551  ;;  %v736_v2 = vmul.f32 %v1536_v30, %v4483_v58  ;;  %v765_v50 = vadd.f32 %v764_v25, %v732_v54  ;;  %v783_v23 = vadd.f32 %v782_v13, %v733_v55  ;;  %v4485_v55 = vld [vmem:[#allocation69_spill] sm:$0xff]  ;;  %v4486_v25 = vld [vmem:[#allocation72_spill] sm:$0xff] }
  0xca   : > { %v807_v7 = vadd.f32 %v806_v53, %v687_v0  ;;  %v1554_v18 = vpop.eup %1553  ;;  %1567 = vpow2.f32 %v2885_v28  ;;  %v612_v49 = vadd.f32 %v1552_v8, %v611_v15  ;;  %v737_v12 = vmul.f32 %v1538_v22, %v4484_v16  ;;  %v4490_v58 = vld [vmem:[#allocation76_spill] sm:$0xff] }
  0xcb   : > { %v791_v36 = vadd.f32 %v790_v6, %v694_v19  ;;  %v2966_v33 = vpop.eup %1555  ;;  %1569 = vpow2.f32 %v2893_v4  ;;  %v630_v21 = vadd.f32 %v1554_v18, %v629_v52  ;;  %v646_v62 = vadd.f32 %v2952_v57, %v645_v43  ;;  %v4487_v52 = vld [vmem:[#allocation36_spill] sm:$0xff] }
  0xcc   : > { %v808_v41 = vadd.f32 %v807_v7, %v691_v26  ;;  %v2970_v35 = vpop.eup %1557  ;;  %v664_v30 = vadd.f32 %v2956_v61, %v663_v14  ;;  %v703_v28 = vmul.f32 %v2788_v34, %v4485_v55  ;;  %v706_v22 = vmul.f32 %v2810_v32, %v4486_v25  ;;  %v4488_v14 = vld [vmem:[#allocation37_spill] sm:$0xff] }
  0xcd   : > { %v792_v0 = vadd.f32 %v791_v36, %v698_v29  ;;  %v1560_v54 = vpop.eup %1559  ;;  %v766_v19 = vadd.f32 %v765_v50, %v736_v2  ;;  %v740_v53 = vmul.f32 %v1544_v9, %v4487_v52  ;;  %v784_v43 = vadd.f32 %v783_v23, %v737_v12  ;;  %v4489_v32 = vld [vmem:[#allocation73_spill] sm:$0xff]  ;;  %v4492_v23 = vld [vmem:[#allocation80_spill] sm:$0xff] }
  0xce   : > { %v809_v13 = vadd.f32 %v808_v41, %v695_v44  ;;  %v1562_v15 = vpop.eup %1561  ;;  %v613_v4 = vadd.f32 %v1560_v54, %v612_v49  ;;  %v647_v63 = vadd.f32 %v2966_v33, %v646_v62  ;;  %v741_v29 = vmul.f32 %v1546_v24, %v4488_v14  ;;  %v4494_v49 = vld [vmem:[#allocation84_spill] sm:$0xff] }
  0xcf   : > { %v793_v26 = vadd.f32 %v792_v0, %v702_v51  ;;  %v631_v60 = vadd.f32 %v1562_v15, %v630_v21  ;;  %v665_v34 = vadd.f32 %v2970_v35, %v664_v30  ;;  %v707_v44 = vmul.f32 %v2814_v45, %v4489_v32  ;;  %v4491_v51 = vld [vmem:[#allocation77_spill] sm:$0xff]  ;;  %v4495_v21 = vld [vmem:[#allocation87_spill] sm:$0xff]  ;;  %v4496_v41 = vld [vmem:[#allocation88_spill] sm:$0xff] }
  0xd0   : > { %v810_v38 = vadd.f32 %v809_v13, %v699_v17  ;;  %v2980_v6 = vpop.eup %1563  ;;  %1571 = vlog2.f32 %v613_v4  ;;  %v710_v2 = vmul.f32 %v2828_v46, %v4490_v58  ;;  %v711_v50 = vmul.f32 %v2832_v3, %v4491_v51  ;;  %v4493_v17 = vld [vmem:[#allocation81_spill] sm:$0xff] }
  0xd1   : > { %v2987_v9 = vpop.eup %1565  ;;  %1573 = vlog2.f32 %v631_v60  ;;  %v714_v24 = vmul.f32 %v2846_v42, %v4492_v23  ;;  %v715_v7 = vmul.f32 %v2850_v39, %v4493_v17  ;;  %v718_v16 = vmul.f32 %v2861_v10, %v4494_v49  ;;  %v4497_v13 = vld [vmem:[#allocation85_spill] sm:$0xff]  ;;  %v4505_v23 = vld [vmem:[#allocation26_spill] sm:$0xff] }
  0xd2   : > { %v767_v12 = vadd.f32 %v766_v19, %v740_v53  ;;  %v794_v45 = vadd.f32 %v793_v26, %v706_v22  ;;  %v811_v36 = vadd.f32 %v810_v38, %v703_v28  ;;  %v648_v46 = vadd.f32 %v2980_v6, %v647_v63  ;;  %v4498_v22 = vld [vmem:[#allocation15_spill] sm:$0xff]  ;;  %v4499_v19 = vld [vmem:[#allocation17_spill] sm:$0xff] }
  0xd3   : > { %v744_v62 = vmul.f32 %v1552_v8, %v4495_v21  ;;  %v745_v30 = vmul.f32 %v1554_v18, %v4496_v41  ;;  %v785_v0 = vadd.f32 %v784_v43, %v741_v29  ;;  %v666_v55 = vadd.f32 %v2987_v9, %v665_v34  ;;  %v4500_v18 = vld [vmem:[#allocation18_spill] sm:$0xff]  ;;  %v4501_v63 = vld [vmem:[#allocation89_spill] sm:$0xff] }
  0xd4   : > { %v1568_v3 = vpop.eup %1567  ;;  %v795_v42 = vadd.f32 %v794_v45, %v710_v2  ;;  %v812_v25 = vadd.f32 %v811_v36, %v707_v44  ;;  %1575 = vrcp.f32 %v613_v4  ;;  %v719_v10 = vmul.f32 %v2865_v47, %v4497_v13  ;;  %v4502_v32 = vld [vmem:[#allocation21_spill] sm:$0xff]  ;;  %v4503_v44 = vld [vmem:[#allocation22_spill] sm:$0xff] }
  0xd5   : > { %v3001_v39 = vpop.eup %1569  ;;  %v722_v28 = vmul.f32 %v2877_v37, %v4498_v22  ;;  %1577 = vrcp.f32 %v631_v60  ;;  %v723_v8 = vmul.f32 %v2881_v48, %v4499_v19  ;;  %v726_v52 = vmul.f32 %v2895_v40, %v4500_v18  ;;  %v4506_v49 = vld [vmem:[#allocation29_spill] sm:$0xff]  ;;  %v4507_v45 = vld [vmem:[#allocation30_spill] sm:$0xff] }
  0xd6   : > { %v796_v53 = vadd.f32 %v795_v42, %v714_v24  ;;  %v813_v43 = vadd.f32 %v812_v25, %v711_v50  ;;  %v649_v26 = vadd.f32 %v1568_v3, %v648_v46  ;;  %v748_v4 = vmul.f32 %v1560_v54, %v4501_v63  ;;  %v4504_v54 = vld [vmem:[#allocation25_spill] sm:$0xff]  ;;  %v4510_v25 = vld [vmem:[#allocation35_spill] sm:$0xff]  ;;  %v3063_v63 = vld [vmem:[%s1931_s3 + $0x18] sm:$0xff] }
  0xd7   : > { %v768_v14 = vadd.f32 %v767_v12, %v744_v62  ;;  %v786_v29 = vadd.f32 %v785_v0, %v745_v30  ;;  %v667_v38 = vadd.f32 %v3001_v39, %v666_v55  ;;  %v749_v47 = vmul.f32 %v1562_v15, %v4443_v59  ;;  %v4509_v30 = vld [vmem:[#allocation34_spill] sm:$0xff] }
  0xd8   : > { %v797_v34 = vadd.f32 %v796_v53, %v718_v16  ;;  %v814_v37 = vadd.f32 %v813_v43, %v715_v7  ;;  %v727_v48 = vmul.f32 %v2901_v1, %v4502_v32  ;;  %v730_v40 = vmul.f32 %v2915_v27, %v4503_v44  ;;  %v4514_v53 = vld [vmem:[#allocation41_spill] sm:$0xff]  ;;  %v3103_v44 = vld [vmem:[%s1931_s3 + $0x58] sm:$0xff] }
  0xd9   : > { %1579 = vlog2.f32 %v649_v26  ;;  %v731_v50 = vmul.f32 %v2921_v5, %v4504_v54  ;;  %v734_v59 = vmul.f32 %v2935_v20, %v4505_v23  ;;  %v769_v15 = vadd.f32 %v768_v14, %v748_v4  ;;  %v4508_v20 = vld [vmem:[#allocation31_spill] sm:$0xff]  ;;  %v3068_v14 = vld [vmem:[%s1931_s3 + $0x20] sm:$0xff]  ;;  %v3128_v54 = vld [vmem:[%s1931_s3 + $0x78] sm:$0xff] }
  0xda   : > { %v1572_v60 = vpop.eup %1571  ;;  %v798_v58 = vadd.f32 %v797_v34, %v722_v28  ;;  %v815_v2 = vadd.f32 %v814_v37, %v719_v10  ;;  %1581 = vlog2.f32 %v667_v38  ;;  %v787_v24 = vadd.f32 %v786_v29, %v749_v47  ;;  %v4511_v10 = vld [vmem:[#allocation38_spill] sm:$0xff]  ;;  %v4516_v4 = vld [vmem:[#allocation43_spill] sm:$0xff]  ;;  %v3088_v47 = vld [vmem:[%s1931_s3 + $0x40] sm:$0xff] }
  0xdb   : > { %v1574_v51 = vpop.eup %1573  ;;  %v669_v1 = vmul.f32 0.6931472, %v1572_v60  ;;  %v735_v27 = vmul.f32 %v2939_v56, %v4506_v49  ;;  %1583 = vrcp.f32 %v649_v26  ;;  %v738_v36 = vmul.f32 %v2952_v57, %v4507_v45  ;;  %v3073_v29 = vld [vmem:[%s1931_s3 + $0x28] sm:$0xff]  ;;  %v3098_v37 = vld [vmem:[%s1931_s3 + $0x50] sm:$0xff]  ;;  %v3173_v45 = vld [vmem:[%s1931_s3 + $0xc0] sm:$0xff] }
  0xdc   : > { %v799_v17 = vadd.f32 %v798_v58, %v726_v52  ;;  %v816_v7 = vadd.f32 %v815_v2, %v723_v8  ;;  %v671_v12 = vmul.f32 0.6931472, %v1574_v51  ;;  %v739_v62 = vmul.f32 %v2956_v61, %v4508_v20  ;;  %v4512_v8 = vld [vmem:[#allocation39_spill] sm:$0xff]  ;;  %v4513_v52 = vld [vmem:[#allocation40_spill] sm:$0xff]  ;;  %v3093_v34 = vld [vmem:[%s1931_s3 + $0x48] sm:$0xff] }
  0xdd   : > { %1585 = vrcp.f32 %v667_v38  ;;  %v742_v0 = vmul.f32 %v2966_v33, %v4509_v30  ;;  %v743_v57 = vmul.f32 %v2970_v35, %v4510_v25  ;;  %v746_v22 = vmul.f32 %v2980_v6, %v4511_v10  ;;  %v3042_v35 = vld [vmem:[%s1931_s3] sm:$0xff]  ;;  %v3047_v6 = vld [vmem:[%s1931_s3 + $0x8] sm:$0xff]  ;;  %v3083_v38 = vld [vmem:[%s1931_s3 + $0x38] sm:$0xff] }
  0xde   : > { %v1576_v16 = vpop.eup %1575  ;;  %v800_v5 = vadd.f32 %v799_v17, %v730_v40  ;;  %v817_v46 = vadd.f32 %v816_v7, %v727_v48  ;;  %v747_v33 = vmul.f32 %v2987_v9, %v4512_v8  ;;  %v750_v18 = vmul.f32 %v1568_v3, %v4446_v31  ;;  %v3052_v9 = vld [vmem:[%s1931_s3 + $0x10] sm:$0xff]  ;;  %v4515_v31 = vld [vmem:[#allocation42_spill] sm:$0xff]  ;;  %v3108_v40 = vld [vmem:[%s1931_s3 + $0x60] sm:$0xff] }
  0xdf   : > { %v1578_v21 = vpop.eup %1577  ;;  %v825_v41 = vmul.f32 %v1576_v16, %v769_v15  ;;  %vm840_vm0 = vcmp.eq.f32.partialorder %v3042_v35, %v4513_v52  ;;  %vm841_vm1 = vcmp.eq.f32.partialorder %v3047_v6, %v4514_v53  ;;  %vm842_vm2 = vcmp.eq.f32.partialorder %v3052_v9, %v4515_v31  ;;  %v3113_v58 = vld [vmem:[%s1931_s3 + $0x68] sm:$0xff]  ;;  %v3118_v2 = vld [vmem:[%s1931_s3 + $0x70] sm:$0xff]  ;;  %v3148_v7 = vld [vmem:[%s1931_s3 + $0x98] sm:$0xff] }
  0xe0   : > { %v801_v56 = vadd.f32 %v800_v5, %v734_v59  ;;  %v818_v55 = vadd.f32 %v817_v46, %v731_v50  ;;  %v827_v42 = vmul.f32 %v1578_v21, %v787_v24  ;;  %v3059_v3 = vmul.f32 %v3001_v39, %v4450_v11  ;;  %v3078_v11 = vld [vmem:[%s1931_s3 + $0x30] sm:$0xff]  ;;  %v3133_v50 = vld [vmem:[%s1931_s3 + $0x80] sm:$0xff]  ;;  %v3138_v23 = vld [vmem:[%s1931_s3 + $0x88] sm:$0xff] }
  0xe1   : > { %v832_v13 = vsub.f32 %v669_v1, %v825_v41  ;;  %vm843_vm3 = vcmp.eq.f32.partialorder %v3063_v63, %v4516_v4  ;;  %vm844_vm4 = vcmp.eq.f32.partialorder %v3068_v14, %v4513_v52  ;;  %vm845_vm5 = vcmp.eq.f32.partialorder %v3073_v29, %v4514_v53  ;;  %v3143_v59 = vld [vmem:[%s1931_s3 + $0x90] sm:$0xff]  ;;  %v3153_v1 = vld [vmem:[%s1931_s3 + $0xa0] sm:$0xff]  ;;  %v3158_v49 = vld [vmem:[%s1931_s3 + $0xa8] sm:$0xff] }
  0xe2   : > { %v802_v61 = vadd.f32 %v801_v56, %v738_v36  ;;  %v819_v28 = vadd.f32 %v818_v55, %v735_v27  ;;  %v833_v19 = vsub.f32 %v671_v12, %v827_v42  ;;  %vm846_vm6 = vcmp.eq.f32.partialorder %v3078_v11, %v4515_v31  ;;  %v3163_v27 = vld [vmem:[%s1931_s3 + $0xb0] sm:$0xff]  ;;  %v3168_v12 = vld [vmem:[%s1931_s3 + $0xb8] sm:$0xff]  ;;  %v3178_v36 = vld [vmem:[%s1931_s3 + $0xc8] sm:$0xff] }
  0xe3   : > { %836 = vst [vmem:[%s3038_s23] sm:$0xff] %v832_v13  ;;  %v1580_v39 = vpop.eup %1579  ;;  %vm847_vm7 = vcmp.eq.f32.partialorder %v3083_v38, %v4516_v4  ;;  %vm848_vm8 = vcmp.eq.f32.partialorder %v3088_v47, %v4513_v52  ;;  %vm849_vm9 = vcmp.eq.f32.partialorder %v3093_v34, %v4514_v53  ;;  %vm850_vm10 = vcmp.eq.f32.partialorder %v3098_v37, %v4515_v31  ;;  %v3183_v5 = vld [vmem:[%s1931_s3 + $0xd0] sm:$0xff]  ;;  %v3197_v41 = vld [vmem:[%s1931_s3 + $0xe0] sm:$0xff]  ;;  %v3202_v30 = vld [vmem:[%s1931_s3 + $0xe8] sm:$0xff] }
  0xe4   : > { %v803_v43 = vadd.f32 %v802_v61, %v742_v0  ;;  %v820_v26 = vadd.f32 %v819_v28, %v739_v62  ;;  %837 = vst [vmem:[%s3038_s23 + $0x8] sm:$0xff] %v833_v19  ;;  %v1582_v60 = vpop.eup %1581  ;;  %vm851_vm11 = vcmp.eq.f32.partialorder %v3103_v44, %v4516_v4  ;;  %v673_v15 = vmul.f32 0.6931472, %v1580_v39  ;;  %v3192_v62 = vld [vmem:[%s1931_s3 + $0xd8] sm:$0xff]  ;;  %v3207_v0 = vld [vmem:[%s1931_s3 + $0xf0] sm:$0xff]  ;;  %v3218_v55 = vld [vmem:[%s1931_s3 + $0x100] sm:$0xff] }
  0xe5   : > { %v1584_v51 = vpop.eup %1583  ;;  %v3188_v46 = vmul.f32 0.6931472, %v1582_v60  ;;  %v3213_v56 = vld [vmem:[%s1931_s3 + $0xf8] sm:$0xff]  ;;  %v3223_v42 = vld [vmem:[%s1931_s3 + $0x108] sm:$0xff]  ;;  %v3228_v25 = vld [vmem:[%s1931_s3 + $0x110] sm:$0xff] }
  0xe6   : > { %v804_v32 = vadd.f32 %v803_v43, %v746_v22  ;;  %v821_v48 = vadd.f32 %v820_v26, %v743_v57  ;;  %v3233_v10 = vld [vmem:[%s1931_s3 + $0x118] sm:$0xff]  ;;  %v3238_v22 = vld [vmem:[%s1931_s3 + $0x120] sm:$0xff]  ;;  %v3243_v61 = vld [vmem:[%s1931_s3 + $0x128] sm:$0xff] }
  0xe7   : > { %v1586_v16 = vpop.eup %1585  ;;  %v3248_v28 = vld [vmem:[%s1931_s3 + $0x130] sm:$0xff]  ;;  %v3260_v19 = vld [vmem:[%s1931_s3 + $0x138] sm:$0xff]  ;;  %v3265_v8 = vld [vmem:[%s1931_s3 + $0x140] sm:$0xff] }
  0xe8   : > { %v805_v24 = vadd.f32 %v804_v32, %v750_v18  ;;  %v822_v17 = vadd.f32 %v821_v48, %v747_v33  ;;  %v3270_v33 = vld [vmem:[%s1931_s3 + $0x148] sm:$0xff]  ;;  %v3275_v18 = vld [vmem:[%s1931_s3 + $0x150] sm:$0xff]  ;;  %v3284_v43 = vld [vmem:[%s1931_s3 + $0x158] sm:$0xff]  ;;  %v1802_v32 = vmov 19  }
  0xe9   : > { %vm883_vm15 = vcmp.eq.f32.partialorder %v3284_v43, %v4516_v4  ;;  %v3289_v26 = vld [vmem:[%s1931_s3 + $0x160] sm:$0xff]  ;;  %v3294_v39 = vld [vmem:[%s1931_s3 + $0x168] sm:$0xff]  ;;  %v3299_v60 = vld [vmem:[%s1931_s3 + $0x170] sm:$0xff]  ;;  %v3307_v48 = vsel %vm840_vm0, 0, %v1802_v32  ;;  %v3363_v63 = vsel %vm846_vm6, 1, %v1802_v32  ;;  %v3408_v38 = vsel %vm850_vm10, 2, %v1802_v32 }
  0xea   : > { %v823_v21 = vadd.f32 %v822_v17, %v3059_v3  ;;  %v829_v20 = vmul.f32 %v1584_v51, %v805_v24  ;;  %vm884_vm12 = vcmp.eq.f32.partialorder %v3289_v26, %v4513_v52  ;;  %vm885_vm14 = vcmp.eq.f32.partialorder %v3294_v39, %v4514_v53  ;;  %v3322_v24 = vld [vmem:[%s1931_s3 + $0x178] sm:$0xff]  ;;  %v3327_v35 = vld [vmem:[%s1931_s3 + $0x180] sm:$0xff]  ;;  %v3332_v6 = vld [vmem:[%s1931_s3 + $0x188] sm:$0xff]  ;;  %4520 = vst [vmem:[#allocation50_spill] sm:$0xff] %v3408_v38 }
  0xeb   : > { %v3313_v51 = vsel %vm841_vm1, 0, %v1802_v32  ;;  %vm887_vm0 = vcmp.eq.f32.partialorder %v3322_v24, %v4516_v4  ;;  %vm888_vm13 = vcmp.eq.f32.partialorder %v3327_v35, %v4513_v52  ;;  %vm889_vm1 = vcmp.eq.f32.partialorder %v3332_v6, %v4514_v53  ;;  %v3337_v9 = vld [vmem:[%s1931_s3 + $0x190] sm:$0xff]  ;;  %v3372_v14 = vld [vmem:[%s1931_s3 + $0x1a0] sm:$0xff]  ;;  %v3377_v29 = vld [vmem:[%s1931_s3 + $0x1a8] sm:$0xff] }
  0xec   : > { %v831_v57 = vmul.f32 %v1586_v16, %v823_v21  ;;  %v834_v13 = vsub.f32 %v673_v15, %v829_v20  ;;  %v3319_v15 = vsel %vm842_vm2, 0, %v1802_v32  ;;  %vm890_vm2 = vcmp.eq.f32.partialorder %v3337_v9, %v4515_v31  ;;  %v3367_v21 = vld [vmem:[%s1931_s3 + $0x198] sm:$0xff]  ;;  %v3382_v11 = vld [vmem:[%s1931_s3 + $0x1b0] sm:$0xff]  ;;  %v3416_v47 = vld [vmem:[%s1931_s3 + $0x1c0] sm:$0xff] }
  0xed   : > { %v3345_v17 = vsel %vm843_vm3, 0, %v1802_v32  ;;  %v3351_v16 = vsel %vm844_vm4, 1, %v1802_v32  ;;  %vm891_vm3 = vcmp.eq.f32.partialorder %v3367_v21, %v4516_v4  ;;  %vm892_vm4 = vcmp.eq.f32.partialorder %v3372_v14, %v4513_v52  ;;  %v3421_v34 = vld [vmem:[%s1931_s3 + $0x1c8] sm:$0xff]  ;;  %v3426_v37 = vld [vmem:[%s1931_s3 + $0x1d0] sm:$0xff] }
  0xee   : > { %v835_v3 = vsub.f32 %v3188_v46, %v831_v57  ;;  %838 = vst [vmem:[%s3038_s23 + $0x10] sm:$0xff] %v834_v13  ;;  %4517 = vst [vmem:[#allocation46_spill] sm:$0xff] %v3345_v17  ;;  %v3357_v46 = vsel %vm845_vm5, 1, %v1802_v32  ;;  %vm893_vm5 = vcmp.eq.f32.partialorder %v3377_v29, %v4514_v53  ;;  %v3390_v20 = vsel %vm847_vm7, 1, %v1802_v32 }
  0xef   : > { %v3396_v57 = vsel %vm848_vm8, 2, %v1802_v32  ;;  %v3402_v13 = vsel %vm849_vm9, 2, %v1802_v32  ;;  %v3434_v38 = vsel %vm851_vm11, 2, %v1802_v32  ;;  %vm4522_vm8 = vcmp.eq.f32.partialorder %v3108_v40, %v4513_v52 }
  0xf0   : > { %839 = vst [vmem:[%s3038_s23 + $0x18] sm:$0xff] %v835_v3  ;;  %4518 = vst [vmem:[#allocation45_spill] sm:$0xff] %v3396_v57  ;;  %v3411_v3 = vld [vmem:[%s1931_s3 + $0x1b8] sm:$0xff]  ;;  %vm4524_vm9 = vcmp.eq.f32.partialorder %v3113_v58, %v4514_v53  ;;  %vm4526_vm10 = vcmp.eq.f32.partialorder %v3118_v2, %v4515_v31 }
  0xf1   : > { %4519 = vst [vmem:[#allocation48_spill] sm:$0xff] %v3402_v13  ;;  %4521 = vst [vmem:[#allocation53_spill] sm:$0xff] %v3434_v38  ;;  %v3440_v13 = vsel %vm4522_vm8, 3, %v1802_v32  ;;  %v3446_v57 = vsel %vm4524_vm9, 3, %v1802_v32  ;;  %v3452_v17 = vsel %vm4526_vm10, 3, %v1802_v32 }
  0xf2   : > { %4523 = vst [vmem:[#allocation56_spill] sm:$0xff] %v3440_v13  ;;  %4525 = vst [vmem:[#allocation57_spill] sm:$0xff] %v3446_v57 }
  0xf3   : > { %4527 = vst [vmem:[#allocation98_spill] sm:$0xff] %v3452_v17 }
  0xf4   : > { %1676 = shalt.err (!%p1673_p10)
}
  0xf5   : > { %s1677_s22 = scalar_lea.hbm %s3257_s7, 512  ;;  %s1681_s17 = scalar_lea.hbm %s4112_s1, 2048 }
  0xf6   : > { %p1678_p11 = scmp.ne.s32.totalorder %s3257_s7, %s1677_s22  ;;  %p1682_p1 = scmp.lt.u32.totalorder %s3257_s7, %s4112_s1 }
  0xf7   : > { %p1683_p2 = scmp.lt.u32.totalorder %s1681_s17, %s1677_s22  ;;  %p1685_p4 = scmp.lt.u32.totalorder %s1677_s22, %s3257_s7 }
  0xf8   : > { %p1679_p13 = pnand %p1678_p11, %p1887_p9 }
  0xf9   : > { %p1684_p3 = por %p1683_p2, %p1682_p1 }
  0xfa   : > { %p1680_p0 = pneg %p1679_p13 }
  0xfb   : > { %p1686_p5 = por %p1685_p4, %p1684_p3 }
  0xfd   : > { %p1687_p6 = pnand %p1686_p5, %p1680_p0 }
  0xff   : > { %1690 = shalt.err (!%p1687_p6)
}
 0x100   : > { %s1804_s6 = smov 128   ;;  %s1805_s18 = smov 256   ;;  %v3479_v44 = vld [vmem:[%s1931_s3 + $0x1d8] sm:$0xff]  ;;  %v3484_v40 = vld [vmem:[%s1931_s3 + $0x1e0] sm:$0xff]  ;;  %v3489_v58 = vld [vmem:[%s1931_s3 + $0x1e8] sm:$0xff]  ;;  %vm4528_vm11 = vcmp.eq.f32.partialorder %v3128_v54, %v4516_v4  ;;  %vm4530_vm8 = vcmp.eq.f32.partialorder %v3133_v50, %v4513_v52  ;;  %vm4532_vm9 = vcmp.eq.f32.partialorder %v3138_v23, %v4514_v53  ;;  %vm4534_vm10 = vcmp.eq.f32.partialorder %v3143_v59, %v4515_v31 }
 0x101   : > { %s1806_s26 = smov 8   ;;  %v3494_v2 = vld [vmem:[%s1931_s3 + $0x1f0] sm:$0xff]  ;;  %v3502_v17 = vsel %vm4528_vm11, 3, %v1802_v32  ;;  %v3508_v57 = vsel %vm4530_vm8, 4, %v1802_v32  ;;  %v3514_v13 = vsel %vm4532_vm9, 4, %v1802_v32  ;;  %v3520_v54 = vsel %vm4534_vm10, 4, %v1802_v32 }
 0x102   : > { %1332 = dma.vmem_to_hbm [thread:$0]  (%p1887_p9), %s3279_s5, 512, %s3257_s7, %s1141_s8, %s1804_s6, %s1805_s18, %s1806_s26   ;;  %4529 = vst [vmem:[#allocation62_spill] sm:$0xff] %v3502_v17  ;;  %4531 = vst [vmem:[#allocation63_spill] sm:$0xff] %v3508_v57  ;;  %vm4536_vm11 = vcmp.eq.f32.partialorder %v3148_v7, %v4516_v4  ;;  %vm4538_vm8 = vcmp.eq.f32.partialorder %v3153_v1, %v4513_v52  ;;  %vm4540_vm9 = vcmp.eq.f32.partialorder %v3158_v49, %v4514_v53  ;;  %v3735_v43 = vsel %vm887_vm0, 11, %v1802_v32 }
 0x103   : > { %4533 = vst [vmem:[#allocation100_spill] sm:$0xff] %v3514_v13  ;;  %4535 = vst [vmem:[#allocation66_spill] sm:$0xff] %v3520_v54  ;;  %v3523_v17 = vld [vmem:[%s1931_s3 + $0x1f8] sm:$0xff]  ;;  %v3528_v50 = vld [vmem:[%s1931_s3 + $0x200] sm:$0xff]  ;;  %v3546_v54 = vsel %vm4536_vm11, 4, %v1802_v32  ;;  %v3552_v13 = vsel %vm4538_vm8, 5, %v1802_v32  ;;  %vm4542_vm10 = vcmp.eq.f32.partialorder %v3163_v27, %v4515_v31  ;;  %vm4546_vm11 = vcmp.eq.f32.partialorder %v3173_v45, %v4513_v52 }
 0x104   : > { %v3533_v23 = vld [vmem:[%s1931_s3 + $0x208] sm:$0xff]  ;;  %v3538_v59 = vld [vmem:[%s1931_s3 + $0x210] sm:$0xff]  ;;  %4537 = vst [vmem:[#allocation67_spill] sm:$0xff] %v3546_v54  ;;  %4539 = vst [vmem:[#allocation101_spill] sm:$0xff] %v3552_v13  ;;  %v3558_v57 = vsel %vm4540_vm9, 5, %v1802_v32  ;;  %v3564_v7 = vsel %vm4542_vm10, 5, %v1802_v32  ;;  %vm4544_vm10 = vcmp.eq.f32.partialorder %v3168_v12, %v4516_v4  ;;  %vm4548_vm9 = vcmp.eq.f32.partialorder %v3178_v36, %v4514_v53 }
 0x105   : > { %4541 = vst [vmem:[#allocation70_spill] sm:$0xff] %v3558_v57  ;;  %4543 = vst [vmem:[#allocation71_spill] sm:$0xff] %v3564_v7  ;;  %v3567_v54 = vld [vmem:[%s1931_s3 + $0x218] sm:$0xff]  ;;  %v1655_v1 = vld [vmem:[%s1931_s3 + $0x220] sm:$0xff]  ;;  %v3581_v27 = vsel %vm4544_vm10, 5, %v1802_v32  ;;  %v3587_v7 = vsel %vm4546_vm11, 6, %v1802_v32  ;;  %vm4550_vm7 = vcmp.eq.f32.partialorder %v3183_v5, %v4515_v31  ;;  %vm4554_vm8 = vcmp.eq.f32.partialorder %v3202_v30, %v4514_v53 }
 0x106   : > { %v1656_v49 = vld [vmem:[%s1931_s3 + $0x228] sm:$0xff]  ;;  %v1657_v57 = vld [vmem:[%s1931_s3 + $0x230] sm:$0xff]  ;;  %4545 = vst [vmem:[#allocation103_spill] sm:$0xff] %v3581_v27  ;;  %4547 = vst [vmem:[#allocation74_spill] sm:$0xff] %v3587_v7  ;;  %v3593_v13 = vsel %vm4548_vm9, 6, %v1802_v32  ;;  %v3599_v12 = vsel %vm4550_vm7, 6, %v1802_v32  ;;  %vm4552_vm9 = vcmp.eq.f32.partialorder %v3192_v62, %v4516_v4  ;;  %vm4553_vm7 = vcmp.eq.f32.partialorder %v3197_v41, %v4513_v52 }
 0x107   : > { %4549 = vst [vmem:[#allocation75_spill] sm:$0xff] %v3593_v13  ;;  %4551 = vst [vmem:[#allocation78_spill] sm:$0xff] %v3599_v12  ;;  %v1658_v27 = vld [vmem:[%s1931_s3 + $0x238] sm:$0xff]  ;;  %v1659_v38 = vld [vmem:[%s1931_s3 + $0x240] sm:$0xff]  ;;  %v3613_v36 = vsel %vm4552_vm9, 6, %v1802_v32  ;;  %v3619_v5 = vsel %vm4553_vm7, 7, %v1802_v32  ;;  %vm4555_vm6 = vcmp.eq.f32.partialorder %v3207_v0, %v4515_v31  ;;  %vm4557_vm7 = vcmp.eq.f32.partialorder %v3213_v56, %v4516_v4 }
 0x108   : > { %vm911_vm10 = vcmp.eq.f32.partialorder %v1658_v27, %v4516_v4  ;;  %v1660_v45 = vld [vmem:[%s1931_s3 + $0x248] sm:$0xff]  ;;  %v1661_v7 = vld [vmem:[%s1931_s3 + $0x250] sm:$0xff]  ;;  %v3625_v12 = vsel %vm4554_vm8, 7, %v1802_v32  ;;  %v3631_v13 = vsel %vm4555_vm6, 7, %v1802_v32  ;;  %v1662_v62 = vld [vmem:[%s1931_s3 + $0x258] sm:$0xff]  ;;  %v3639_v41 = vsel %vm4557_vm7, 7, %v1802_v32 }
 0x109   : > { %vm913_vm11 = vcmp.eq.f32.partialorder %v1660_v45, %v4514_v53  ;;  %4556 = vst [vmem:[#allocation79_spill] sm:$0xff] %v3631_v13  ;;  %vm4558_vm8 = vcmp.eq.f32.partialorder %v3218_v55, %v4513_v52  ;;  %vm4559_vm6 = vcmp.eq.f32.partialorder %v3223_v42, %v4514_v53  ;;  %vm4560_vm9 = vcmp.eq.f32.partialorder %v3228_v25, %v4515_v31  ;;  %s1309_s3 = sshll.u32 %s1927_s20, 3  ;;  %s1315_s5 = sshll.u32 %s1781_s13, 1 }
 0x10a   : > { %v3645_v30 = vsel %vm4558_vm8, 8, %v1802_v32  ;;  %v3651_v0 = vsel %vm4559_vm6, 8, %v1802_v32  ;;  %v3657_v13 = vsel %vm4560_vm9, 8, %v1802_v32  ;;  %vm4561_vm7 = vcmp.eq.f32.partialorder %v3233_v10, %v4516_v4  ;;  %s1175_s13 = sadd.s32 %s1777_s12, %s1315_s5  ;;  %s217_s7 = scalar_lea.vmem [#allocation6], %s1309_s3 }
 0x10b   : > { %v3663_v56 = vsel %vm4561_vm7, 8, %v1802_v32  ;;  %vm4562_vm8 = vcmp.eq.f32.partialorder %v3238_v22, %v4513_v52  ;;  %vm4563_vm6 = vcmp.eq.f32.partialorder %v3243_v61, %v4514_v53  ;;  %vm4564_vm9 = vcmp.eq.f32.partialorder %v3248_v28, %v4515_v31  ;;  %s1316_s12 = sshll.u32 %s1175_s13, 7  ;;  %s1179_s8 = sshll.u32 %s217_s7, 4  ;;  %s4059_s8 = int_to_ptr.vmem [resolvable:$true] %s1179_s8 }
 0x10c   : > { %v3669_v55 = vsel %vm4562_vm8, 9, %v1802_v32  ;;  %v3675_v42 = vsel %vm4563_vm6, 9, %v1802_v32  ;;  %v3681_v25 = vsel %vm4564_vm9, 9, %v1802_v32  ;;  %vm4565_vm7 = vcmp.eq.f32.partialorder %v3260_v19, %v4516_v4  ;;  %s4057_s22 = scalar_lea.hbm %s4113_s2, %s1316_s12  ;;  %s1146_s23 = scalar_lea.sflag [#allocation7], %s1927_s20 }
 0x10d   : > { %v3687_v10 = vsel %vm4565_vm7, 9, %v1802_v32  ;;  %vm4566_vm8 = vcmp.eq.f32.partialorder %v3265_v8, %v4513_v52  ;;  %vm4567_vm6 = vcmp.eq.f32.partialorder %v3270_v33, %v4514_v53  ;;  %vm4568_vm9 = vcmp.eq.f32.partialorder %v3275_v18, %v4515_v31  ;;  %s1691_s30 = scalar_lea.vmem %s4059_s8, 128  ;;  %s1807_s17 = smov [#allocation6]  }
 0x10e   : > { %v3693_v22 = vsel %vm4566_vm8, 10, %v1802_v32  ;;  %v3699_v61 = vsel %vm4567_vm6, 10, %v1802_v32  ;;  %v3705_v28 = vsel %vm4568_vm9, 10, %v1802_v32  ;;  %v3711_v19 = vsel %vm883_vm15, 10, %v1802_v32  ;;  %p1692_p7 = scmp.ne.s32.totalorder %s4059_s8, %s1691_s30  ;;  %s1695_s21 = sshll.u32 %s1807_s17, 4  ;;  %s1696_s21 = int_to_ptr.vmem [resolvable:$false] %s1695_s21 }
 0x10f   : > { %v3717_v8 = vsel %vm884_vm12, 11, %v1802_v32  ;;  %v3723_v33 = vsel %vm885_vm14, 11, %v1802_v32  ;;  %vm4569_vm7 = vcmp.eq.f32.partialorder %v3299_v60, %v4515_v31  ;;  %v3741_v26 = vsel %vm888_vm13, 12, %v1802_v32  ;;  %s1697_s4 = scalar_lea.vmem %s1696_s21, 256  ;;  %p1698_p11 = scmp.lt.s32.totalorder %s4059_s8, %s1696_s21 }
 0x110   : > { %v3729_v18 = vsel %vm4569_vm7, 11, %v1802_v32  ;;  %v3747_v39 = vsel %vm889_vm1, 12, %v1802_v32  ;;  %v3753_v60 = vsel %vm890_vm2, 12, %v1802_v32  ;;  %v3759_v24 = vsel %vm891_vm3, 12, %v1802_v32  ;;  %p1693_p8 = pnand %p1692_p7, %p1887_p9  ;;  %p1699_p13 = scmp.lt.s32.totalorder %s1697_s4, %s1691_s30 }
 0x111   : > { %v3765_v35 = vsel %vm892_vm4, 13, %v1802_v32  ;;  %v3771_v6 = vsel %vm893_vm5, 13, %v1802_v32  ;;  %vm4570_vm12 = vcmp.eq.f32.partialorder %v3382_v11, %v4515_v31  ;;  %vm4571_vm13 = vcmp.eq.f32.partialorder %v3411_v3, %v4516_v4 }
 0x112   : > { %v3777_v9 = vsel %vm4570_vm12, 13, %v1802_v32  ;;  %v3783_v21 = vsel %vm4571_vm13, 13, %v1802_v32  ;;  %vm4572_vm14 = vcmp.eq.f32.partialorder %v3416_v47, %v4513_v52  ;;  %vm4573_vm15 = vcmp.eq.f32.partialorder %v3421_v34, %v4514_v53  ;;  %p1694_p10 = pneg %p1693_p8  ;;  %p1700_p0 = por %p1699_p13, %p1698_p11 }
 0x113   : > { %v3789_v14 = vsel %vm4572_vm14, 14, %v1802_v32  ;;  %v3795_v29 = vsel %vm4573_vm15, 14, %v1802_v32  ;;  %vm4574_vm0 = vcmp.eq.f32.partialorder %v3426_v37, %v4515_v31  ;;  %vm4575_vm1 = vcmp.eq.f32.partialorder %v3479_v44, %v4516_v4 }
 0x114   : > { %v3801_v11 = vsel %vm4574_vm0, 14, %v1802_v32  ;;  %v3807_v3 = vsel %vm4575_vm1, 14, %v1802_v32  ;;  %vm4576_vm2 = vcmp.eq.f32.partialorder %v3484_v40, %v4513_v52  ;;  %vm4577_vm3 = vcmp.eq.f32.partialorder %v3489_v58, %v4514_v53  ;;  %p1701_p1 = pnand %p1700_p0, %p1694_p10 }
 0x115   : > { %v3813_v47 = vsel %vm4576_vm2, 15, %v1802_v32  ;;  %v3819_v34 = vsel %vm4577_vm3, 15, %v1802_v32  ;;  %vm4578_vm4 = vcmp.eq.f32.partialorder %v3494_v2, %v4515_v31  ;;  %vm4579_vm5 = vcmp.eq.f32.partialorder %v3523_v17, %v4516_v4 }
 0x116   : > { %v3825_v37 = vsel %vm4578_vm4, 15, %v1802_v32  ;;  %v3831_v44 = vsel %vm4579_vm5, 15, %v1802_v32  ;;  %vm4580_vm8 = vcmp.eq.f32.partialorder %v3528_v50, %v4513_v52  ;;  %vm4581_vm6 = vcmp.eq.f32.partialorder %v3533_v23, %v4514_v53 }
 0x117   : > { %v3837_v40 = vsel %vm4580_vm8, 16, %v1802_v32  ;;  %v3843_v58 = vsel %vm4581_vm6, 16, %v1802_v32  ;;  %vm4582_vm9 = vcmp.eq.f32.partialorder %v3538_v59, %v4515_v31  ;;  %vm4583_vm7 = vcmp.eq.f32.partialorder %v3567_v54, %v4516_v4 }
 0x118   : > { %v3849_v2 = vsel %vm4582_vm9, 16, %v1802_v32  ;;  %v3855_v17 = vsel %vm4583_vm7, 16, %v1802_v32  ;;  %vm4584_vm12 = vcmp.eq.f32.partialorder %v1655_v1, %v4513_v52  ;;  %vm4585_vm13 = vcmp.eq.f32.partialorder %v1656_v49, %v4514_v53 }
 0x119   : > { %v3860_v50 = vsel %vm4584_vm12, 17, %v1802_v32  ;;  %v3865_v23 = vsel %vm4585_vm13, 17, %v1802_v32  ;;  %vm4586_vm14 = vcmp.eq.f32.partialorder %v1657_v57, %v4515_v31  ;;  %v3875_v54 = vsel %vm911_vm10, 17, %v1802_v32 }
 0x11a   : > { %v3870_v59 = vsel %vm4586_vm14, 17, %v1802_v32  ;;  %vm4587_vm15 = vcmp.eq.f32.partialorder %v1659_v38, %v4513_v52  ;;  %v3885_v49 = vsel %vm913_vm11, 18, %v1802_v32  ;;  %vm4588_vm0 = vcmp.eq.f32.partialorder %v1661_v7, %v4515_v31  ;;  %v4594_v38 = vld [vmem:[#allocation48_spill] sm:$0xff]  ;;  %v4595_v7 = vld [vmem:[#allocation50_spill] sm:$0xff] }
 0x11b   : > { %v3880_v1 = vsel %vm4587_vm15, 18, %v1802_v32  ;;  %v3890_v57 = vsel %vm4588_vm0, 18, %v1802_v32  ;;  %vm4590_vm1 = vcmp.eq.f32.partialorder %v1662_v62, %v4516_v4  ;;  %vm992_vm10 = vcmp.lt.s32.totalorder %v3307_v48, %v3351_v16  ;;  %v4592_v4 = vld [vmem:[#allocation46_spill] sm:$0xff] }
 0x11c   : > { %4589 = vst [vmem:[#allocation90_spill] sm:$0xff] %v3890_v57  ;;  %v3895_v27 = vsel %vm4590_vm1, 18, %v1802_v32  ;;  %vm1028_vm2 = vcmp.lt.s32.totalorder %v3313_v51, %v3357_v46  ;;  %vm1064_vm11 = vcmp.lt.s32.totalorder %v3319_v15, %v3363_v63  ;;  %v993_v52 = vsel %vm992_vm10, %v3307_v48, %v3351_v16  ;;  %v4593_v32 = vld [vmem:[#allocation45_spill] sm:$0xff]  ;;  %v4599_v62 = vld [vmem:[#allocation98_spill] sm:$0xff] }
 0x11d   : > { %4591 = vst [vmem:[#allocation82_spill] sm:$0xff] %v3895_v27  ;;  %v1029_v53 = vsel %vm1028_vm2, %v3313_v51, %v3357_v46  ;;  %v1065_v31 = vsel %vm1064_vm11, %v3319_v15, %v3363_v63  ;;  %vm1100_vm3 = vcmp.lt.s32.totalorder %v4592_v4, %v3390_v20  ;;  %vm994_vm4 = vcmp.lt.s32.totalorder %v993_v52, %v4593_v32  ;;  %v4596_v46 = vld [vmem:[#allocation53_spill] sm:$0xff]  ;;  %v4597_v15 = vld [vmem:[#allocation56_spill] sm:$0xff] }
 0x11e   : > { %vm1030_vm5 = vcmp.lt.s32.totalorder %v1029_v53, %v4594_v38  ;;  %vm1066_vm8 = vcmp.lt.s32.totalorder %v1065_v31, %v4595_v7  ;;  %v1101_v45 = vsel %vm1100_vm3, %v4592_v4, %v3390_v20  ;;  %v995_v48 = vsel %vm994_vm4, %v993_v52, %v4593_v32  ;;  %v4598_v63 = vld [vmem:[#allocation57_spill] sm:$0xff]  ;;  %v4600_v4 = vld [vmem:[#allocation62_spill] sm:$0xff] }
 0x11f   : > { %v1031_v16 = vsel %vm1030_vm5, %v1029_v53, %v4594_v38  ;;  %v1067_v51 = vsel %vm1066_vm8, %v1065_v31, %v4595_v7  ;;  %vm1102_vm6 = vcmp.lt.s32.totalorder %v1101_v45, %v4596_v46  ;;  %vm996_vm9 = vcmp.lt.s32.totalorder %v995_v48, %v4597_v15  ;;  %v4601_v53 = vld [vmem:[#allocation63_spill] sm:$0xff]  ;;  %v4602_v31 = vld [vmem:[#allocation100_spill] sm:$0xff]  ;;  %v4603_v32 = vld [vmem:[#allocation66_spill] sm:$0xff] }
 0x120   : > { %vm1032_vm7 = vcmp.lt.s32.totalorder %v1031_v16, %v4598_v63  ;;  %vm1068_vm12 = vcmp.lt.s32.totalorder %v1067_v51, %v4599_v62  ;;  %v1103_v27 = vsel %vm1102_vm6, %v1101_v45, %v4596_v46  ;;  %v997_v57 = vsel %vm996_vm9, %v995_v48, %v4597_v15  ;;  %v4604_v46 = vld [vmem:[#allocation67_spill] sm:$0xff] }
 0x121   : > { %v1033_v20 = vsel %vm1032_vm7, %v1031_v16, %v4598_v63  ;;  %v1069_v52 = vsel %vm1068_vm12, %v1067_v51, %v4599_v62  ;;  %vm1104_vm13 = vcmp.lt.s32.totalorder %v1103_v27, %v4600_v4  ;;  %vm998_vm14 = vcmp.lt.s32.totalorder %v997_v57, %v4601_v53  ;;  %v4605_v16 = vld [vmem:[#allocation101_spill] sm:$0xff]  ;;  %v4606_v51 = vld [vmem:[#allocation70_spill] sm:$0xff]  ;;  %v4607_v15 = vld [vmem:[#allocation71_spill] sm:$0xff] }
 0x122   : > { %vm1034_vm15 = vcmp.lt.s32.totalorder %v1033_v20, %v4602_v31  ;;  %vm1070_vm0 = vcmp.lt.s32.totalorder %v1069_v52, %v4603_v32  ;;  %v1105_v38 = vsel %vm1104_vm13, %v1103_v27, %v4600_v4  ;;  %v999_v7 = vsel %vm998_vm14, %v997_v57, %v4601_v53  ;;  %v4608_v4 = vld [vmem:[#allocation103_spill] sm:$0xff]  ;;  %v4611_v53 = vld [vmem:[#allocation78_spill] sm:$0xff] }
 0x123   : > { %v1035_v45 = vsel %vm1034_vm15, %v1033_v20, %v4602_v31  ;;  %v1071_v48 = vsel %vm1070_vm0, %v1069_v52, %v4603_v32  ;;  %vm1106_vm1 = vcmp.lt.s32.totalorder %v1105_v38, %v4604_v46  ;;  %vm1000_vm10 = vcmp.lt.s32.totalorder %v999_v7, %v4605_v16  ;;  %v4609_v20 = vld [vmem:[#allocation74_spill] sm:$0xff]  ;;  %v4610_v52 = vld [vmem:[#allocation75_spill] sm:$0xff] }
 0x124   : > { %vm1036_vm2 = vcmp.lt.s32.totalorder %v1035_v45, %v4606_v51  ;;  %vm1072_vm11 = vcmp.lt.s32.totalorder %v1071_v48, %v4607_v15  ;;  %v1107_v63 = vsel %vm1106_vm1, %v1105_v38, %v4604_v46  ;;  %v1001_v62 = vsel %vm1000_vm10, %v999_v7, %v4605_v16 }
 0x125   : > { %v1037_v27 = vsel %vm1036_vm2, %v1035_v45, %v4606_v51  ;;  %v1073_v57 = vsel %vm1072_vm11, %v1071_v48, %v4607_v15  ;;  %vm1108_vm3 = vcmp.lt.s32.totalorder %v1107_v63, %v4608_v4  ;;  %vm1002_vm4 = vcmp.lt.s32.totalorder %v1001_v62, %v4609_v20  ;;  %v4612_v45 = vld [vmem:[#allocation79_spill] sm:$0xff] }
 0x126   : > { %vm1038_vm5 = vcmp.lt.s32.totalorder %v1037_v27, %v4610_v52  ;;  %vm1074_vm8 = vcmp.lt.s32.totalorder %v1073_v57, %v4611_v53  ;;  %v1109_v31 = vsel %vm1108_vm3, %v1107_v63, %v4608_v4  ;;  %v1003_v32 = vsel %vm1002_vm4, %v1001_v62, %v4609_v20 }
 0x127   : > { %v1039_v38 = vsel %vm1038_vm5, %v1037_v27, %v4610_v52  ;;  %v1075_v7 = vsel %vm1074_vm8, %v1073_v57, %v4611_v53  ;;  %vm1110_vm6 = vcmp.lt.s32.totalorder %v1109_v31, %v3613_v36  ;;  %vm1004_vm9 = vcmp.lt.s32.totalorder %v1003_v32, %v3619_v5 }
 0x128   : > { %vm1040_vm7 = vcmp.lt.s32.totalorder %v1039_v38, %v3625_v12  ;;  %vm1076_vm12 = vcmp.lt.s32.totalorder %v1075_v7, %v4612_v45  ;;  %v1111_v48 = vsel %vm1110_vm6, %v1109_v31, %v3613_v36  ;;  %v1005_v46 = vsel %vm1004_vm9, %v1003_v32, %v3619_v5 }
 0x129   : > { %v1041_v16 = vsel %vm1040_vm7, %v1039_v38, %v3625_v12  ;;  %v1077_v51 = vsel %vm1076_vm12, %v1075_v7, %v4612_v45  ;;  %vm1112_vm13 = vcmp.lt.s32.totalorder %v1111_v48, %v3639_v41  ;;  %vm1006_vm14 = vcmp.lt.s32.totalorder %v1005_v46, %v3645_v30 }
 0x12a   : > { %vm1042_vm15 = vcmp.lt.s32.totalorder %v1041_v16, %v3651_v0  ;;  %vm1078_vm0 = vcmp.lt.s32.totalorder %v1077_v51, %v3657_v13  ;;  %v1113_v15 = vsel %vm1112_vm13, %v1111_v48, %v3639_v41  ;;  %v1007_v63 = vsel %vm1006_vm14, %v1005_v46, %v3645_v30 }
 0x12b   : > { %v1043_v36 = vsel %vm1042_vm15, %v1041_v16, %v3651_v0  ;;  %v1079_v5 = vsel %vm1078_vm0, %v1077_v51, %v3657_v13  ;;  %vm1114_vm1 = vcmp.lt.s32.totalorder %v1113_v15, %v3663_v56  ;;  %vm1008_vm10 = vcmp.lt.s32.totalorder %v1007_v63, %v3669_v55 }
 0x12c   : > { %vm1044_vm2 = vcmp.lt.s32.totalorder %v1043_v36, %v3675_v42  ;;  %vm1080_vm11 = vcmp.lt.s32.totalorder %v1079_v5, %v3681_v25  ;;  %v1115_v12 = vsel %vm1114_vm1, %v1113_v15, %v3663_v56  ;;  %v1009_v62 = vsel %vm1008_vm10, %v1007_v63, %v3669_v55 }
 0x12d   : > { %v1045_v41 = vsel %vm1044_vm2, %v1043_v36, %v3675_v42  ;;  %v1081_v30 = vsel %vm1080_vm11, %v1079_v5, %v3681_v25  ;;  %vm1116_vm3 = vcmp.lt.s32.totalorder %v1115_v12, %v3687_v10  ;;  %vm1010_vm4 = vcmp.lt.s32.totalorder %v1009_v62, %v3693_v22 }
 0x12e   : > { %vm1046_vm5 = vcmp.lt.s32.totalorder %v1045_v41, %v3699_v61  ;;  %vm1082_vm8 = vcmp.lt.s32.totalorder %v1081_v30, %v3705_v28  ;;  %v1117_v13 = vsel %vm1116_vm3, %v1115_v12, %v3687_v10  ;;  %v1011_v0 = vsel %vm1010_vm4, %v1009_v62, %v3693_v22 }
 0x12f   : > { %v1047_v56 = vsel %vm1046_vm5, %v1045_v41, %v3699_v61  ;;  %v1083_v55 = vsel %vm1082_vm8, %v1081_v30, %v3705_v28  ;;  %vm1118_vm6 = vcmp.lt.s32.totalorder %v1117_v13, %v3711_v19  ;;  %vm1012_vm9 = vcmp.lt.s32.totalorder %v1011_v0, %v3717_v8 }
 0x130   : > { %vm1048_vm7 = vcmp.lt.s32.totalorder %v1047_v56, %v3723_v33  ;;  %vm1084_vm12 = vcmp.lt.s32.totalorder %v1083_v55, %v3729_v18  ;;  %v1119_v42 = vsel %vm1118_vm6, %v1117_v13, %v3711_v19  ;;  %v1013_v25 = vsel %vm1012_vm9, %v1011_v0, %v3717_v8 }
 0x131   : > { %v1049_v10 = vsel %vm1048_vm7, %v1047_v56, %v3723_v33  ;;  %v1085_v22 = vsel %vm1084_vm12, %v1083_v55, %v3729_v18  ;;  %vm1120_vm13 = vcmp.lt.s32.totalorder %v1119_v42, %v3735_v43  ;;  %vm1014_vm14 = vcmp.lt.s32.totalorder %v1013_v25, %v3741_v26 }
 0x132   : > { %vm1050_vm15 = vcmp.lt.s32.totalorder %v1049_v10, %v3747_v39  ;;  %vm1086_vm0 = vcmp.lt.s32.totalorder %v1085_v22, %v3753_v60  ;;  %v1121_v61 = vsel %vm1120_vm13, %v1119_v42, %v3735_v43  ;;  %v1015_v28 = vsel %vm1014_vm14, %v1013_v25, %v3741_v26 }
 0x133   : > { %v1051_v19 = vsel %vm1050_vm15, %v1049_v10, %v3747_v39  ;;  %v1087_v8 = vsel %vm1086_vm0, %v1085_v22, %v3753_v60  ;;  %vm1122_vm1 = vcmp.lt.s32.totalorder %v1121_v61, %v3759_v24  ;;  %vm1016_vm10 = vcmp.lt.s32.totalorder %v1015_v28, %v3765_v35 }
 0x134   : > { %vm1052_vm2 = vcmp.lt.s32.totalorder %v1051_v19, %v3771_v6  ;;  %vm1088_vm11 = vcmp.lt.s32.totalorder %v1087_v8, %v3777_v9  ;;  %v1123_v33 = vsel %vm1122_vm1, %v1121_v61, %v3759_v24  ;;  %v1017_v18 = vsel %vm1016_vm10, %v1015_v28, %v3765_v35 }
 0x135   : > { %v1053_v43 = vsel %vm1052_vm2, %v1051_v19, %v3771_v6  ;;  %v1089_v26 = vsel %vm1088_vm11, %v1087_v8, %v3777_v9  ;;  %vm1124_vm3 = vcmp.lt.s32.totalorder %v1123_v33, %v3783_v21  ;;  %vm1018_vm4 = vcmp.lt.s32.totalorder %v1017_v18, %v3789_v14 }
 0x136   : > { %vm1054_vm5 = vcmp.lt.s32.totalorder %v1053_v43, %v3795_v29  ;;  %vm1090_vm8 = vcmp.lt.s32.totalorder %v1089_v26, %v3801_v11  ;;  %v1125_v39 = vsel %vm1124_vm3, %v1123_v33, %v3783_v21  ;;  %v1019_v60 = vsel %vm1018_vm4, %v1017_v18, %v3789_v14 }
 0x137   : > { %v1055_v24 = vsel %vm1054_vm5, %v1053_v43, %v3795_v29  ;;  %v1091_v35 = vsel %vm1090_vm8, %v1089_v26, %v3801_v11  ;;  %vm1126_vm6 = vcmp.lt.s32.totalorder %v1125_v39, %v3807_v3  ;;  %vm1020_vm9 = vcmp.lt.s32.totalorder %v1019_v60, %v3813_v47 }
 0x138   : > { %vm1056_vm7 = vcmp.lt.s32.totalorder %v1055_v24, %v3819_v34  ;;  %vm1092_vm12 = vcmp.lt.s32.totalorder %v1091_v35, %v3825_v37  ;;  %v1127_v6 = vsel %vm1126_vm6, %v1125_v39, %v3807_v3  ;;  %v1021_v9 = vsel %vm1020_vm9, %v1019_v60, %v3813_v47 }
 0x139   : > { %v1057_v21 = vsel %vm1056_vm7, %v1055_v24, %v3819_v34  ;;  %v1093_v14 = vsel %vm1092_vm12, %v1091_v35, %v3825_v37  ;;  %vm1128_vm13 = vcmp.lt.s32.totalorder %v1127_v6, %v3831_v44  ;;  %vm1022_vm14 = vcmp.lt.s32.totalorder %v1021_v9, %v3837_v40 }
 0x13a   : > { %vm1058_vm15 = vcmp.lt.s32.totalorder %v1057_v21, %v3843_v58  ;;  %vm1094_vm0 = vcmp.lt.s32.totalorder %v1093_v14, %v3849_v2  ;;  %v1129_v29 = vsel %vm1128_vm13, %v1127_v6, %v3831_v44  ;;  %v1023_v11 = vsel %vm1022_vm14, %v1021_v9, %v3837_v40 }
 0x13b   : > { %v1059_v3 = vsel %vm1058_vm15, %v1057_v21, %v3843_v58  ;;  %v1095_v47 = vsel %vm1094_vm0, %v1093_v14, %v3849_v2  ;;  %vm1130_vm1 = vcmp.lt.s32.totalorder %v1129_v29, %v3855_v17  ;;  %vm1024_vm10 = vcmp.lt.s32.totalorder %v1023_v11, %v3860_v50  ;;  %v4613_v58 = vld [vmem:[#allocation90_spill] sm:$0xff] }
 0x13c   : > { %vm1060_vm2 = vcmp.lt.s32.totalorder %v1059_v3, %v3865_v23  ;;  %vm1096_vm11 = vcmp.lt.s32.totalorder %v1095_v47, %v3870_v59  ;;  %v1131_v34 = vsel %vm1130_vm1, %v1129_v29, %v3855_v17  ;;  %v1025_v37 = vsel %vm1024_vm10, %v1023_v11, %v3860_v50 }
 0x13d   : > { %v1061_v44 = vsel %vm1060_vm2, %v1059_v3, %v3865_v23  ;;  %v1097_v40 = vsel %vm1096_vm11, %v1095_v47, %v3870_v59  ;;  %vm1132_vm3 = vcmp.lt.s32.totalorder %v1131_v34, %v3875_v54  ;;  %vm1026_vm4 = vcmp.lt.s32.totalorder %v1025_v37, %v3880_v1  ;;  %v4614_v59 = vld [vmem:[#allocation82_spill] sm:$0xff] }
 0x13e   : > { %vm1062_vm5 = vcmp.lt.s32.totalorder %v1061_v44, %v3885_v49  ;;  %vm1098_vm8 = vcmp.lt.s32.totalorder %v1097_v40, %v4613_v58  ;;  %v1133_v2 = vsel %vm1132_vm3, %v1131_v34, %v3875_v54  ;;  %v1027_v17 = vsel %vm1026_vm4, %v1025_v37, %v3880_v1 }
 0x13f   : > { %v1063_v50 = vsel %vm1062_vm5, %v1061_v44, %v3885_v49  ;;  %v1099_v23 = vsel %vm1098_vm8, %v1097_v40, %v4613_v58  ;;  %vm1134_vm6 = vcmp.lt.s32.totalorder %v1133_v2, %v4614_v59 }
 0x140   : > { %v1135_v27 = vsel %vm1134_vm6, %v1133_v2, %v4614_v59  ;;  %v1136_v57 = vpack.c.b16 %v1063_v50, %v1027_v17 }
 0x141   : > { %v1137_v4 = vpack.c.b16 %v1135_v27, %v1099_v23 }
 0x143   : > { %v1138_v20 = vpack.c.b8 %v1137_v4, %v1136_v57 }
 0x145   : > { %1139 = vst [vmem:[%s217_s7] sm:$0xff] %v1138_v20 }
 0x146   : > { %1704 = shalt.err (!%p1701_p1)
}
 0x147   : > { %s1705_s20 = scalar_lea.hbm %s4057_s22, 128  ;;  %s1709_s26 = scalar_lea.hbm %s4113_s2, 512 }
 0x148   : > { %p1706_p2 = scmp.ne.s32.totalorder %s4057_s22, %s1705_s20  ;;  %p1710_p5 = scmp.lt.u32.totalorder %s4057_s22, %s4113_s2 }
 0x149   : > { %p1711_p6 = scmp.lt.u32.totalorder %s1709_s26, %s1705_s20  ;;  %p1713_p8 = scmp.lt.u32.totalorder %s1705_s20, %s4057_s22 }
 0x14a   : > { %p1707_p3 = pnand %p1706_p2, %p1887_p9 }
 0x14b   : > { %p1712_p7 = por %p1711_p6, %p1710_p5 }
 0x14c   : > { %p1708_p4 = pneg %p1707_p3 }
 0x14d   : > { %p1714_p10 = por %p1713_p8, %p1712_p7 }
 0x14f   : > { %p1715_p11 = pnand %p1714_p10, %p1708_p4 }
 0x151   : > { %1718 = shalt.err (!%p1715_p11)
}
 0x152   : > { %1333 = dma.vmem_to_hbm [thread:$0]  (%p1887_p9), %s4059_s8, 128, %s4057_s22, %s1146_s23  }
 0x153 PF: > { %p1343_p13 = scmp.ge.s32.totalorder %s1793_s16, 2  ;;  %s1191_s13 = sand.u32 1, %s1765_s9  }
 0x154   : > { %s1192_s12 = scalar_lea.sflag [#allocation4], %s1191_s13 }
 0x155   : > { %p1337_p0 = pnand %p1343_p13, %p1894_p12 }
 0x157   : > { %1756 = dma.done.wait (!%p1337_p0), %s1192_s12, 512  }
 0x158   : > { %1758 = vsyncadd (!%p1337_p0), %s1192_s12, 4294966784  ;;  %s1201_s7 = scalar_lea.sflag [#allocation7], %s1191_s13 }
 0x159   : > { %1760 = dma.done.wait (!%p1337_p0), %s1201_s7, 128  }
 0x15a   : > { %1762 = vsyncadd (!%p1337_p0), %s1201_s7, 4294967168  ;;  %s22_s16 = sadd.s32 1, %s1793_s16   ;;  %s4615_s24 = sld [smem:[#allocation14_spill]] }
 0x15b   : > { %p19_p1 = scmp.ge.s32.totalorder %s22_s16, 6   ;;  %s4616_s9 = smov %s1769_s10 }
 0x15c   : > { %s4617_s10 = smov %s1773_s11  ;;  %s4618_s11 = smov %s1899_s29 }
 0x15d   : > { %s4619_s12 = smov %s1785_s14  ;;  %s4620_s13 = smov %s1789_s15 }
 0x15e   : > { %s4621_s14 = smov %s4624_s19  ;;  %21 = sbr.rel (!%p19_p1) target bundleno = 9 (0x9), region = 91 }
 0x160   : > { %s4622_s15 = smov %s4615_s24 }
 0x165   :  { %1206 = vsyncpa [#allocation3], 1 }
 0x166   :  { %1208 = vsyncpa [#allocation3 + $0x1], 1 }
 0x167   :  { %1209 = vsyncpa [#allocation4], 1 }
 0x168   :  { %1211 = vsyncpa [#allocation4 + $0x1], 1 }
 0x169   :  { %1212 = vsyncpa [#allocation7], 1 }
 0x16a   :  { %1214 = vsyncpa [#allocation7 + $0x1], 1 }

</bundles_post_ra>
